<compile_context>
chip_gen: v5e
topology: v5e:2x2
jax: 0.10.0
libtpu: 0.0.40
codegen_flags: <defaults>
</compile_context>

<pallas_src>
import numpy as np

import jax
import jax.numpy as jnp
from jax.experimental import pallas as pl
from jax.experimental.pallas import tpu as pltpu


# ----------------------------------------------------------------------------
# Static network configuration
# ----------------------------------------------------------------------------
C0, H0, W0 = 4, 16, 16           # network input (C, H, W)
K, STRIDE, PAD = 3, 2, 1         # both conv layers: 3x3, stride 2, padding 1
C1 = 8                           # conv1 out channels
H1 = (H0 + 2 * PAD - K) // STRIDE + 1     # 8
W1 = (W0 + 2 * PAD - K) // STRIDE + 1     # 8
C2 = 16                          # conv2 out channels
H2 = (H1 + 2 * PAD - K) // STRIDE + 1     # 4
W2 = (W1 + 2 * PAD - K) // STRIDE + 1     # 4
NTAP = K * K                     # 9 taps per conv
NSP1 = H1 * W1                   # 64
NSP2 = H2 * W2                   # 16
NFC1, NFC2 = 32, 10
FLAT = C2 * NSP2                 # 256 = flatten size


# ----------------------------------------------------------------------------
# Fused Pallas kernel:
#   conv1 + relu + conv2 + relu + flatten + fc1 + relu + fc2 + relu
# ----------------------------------------------------------------------------
def _make_fused_kernel(batch):
    m1 = batch * NSP1            # conv1 output rows (B*64)
    m2 = batch * NSP2            # conv2 output rows (B*16)

    def kernel(p1_ref, w1_ref, b1_ref,        # conv1: (m1,36), (36,C1), (1,C1)
               g2_ref, w2_ref, b2_ref,        # conv2: (9,m2,m1), (9,C1,C2), (1,C2)
               e_ref, v1_ref, bf1_ref,        # fc1:   (16,B,m2), (16,C2,NFC1), (1,NFC1)
               wf2_ref, bf2_ref,              # fc2:   (NFC1,NFC2), (1,NFC2)
               out_ref):                      # out:   (B, NFC2)
        f32 = jnp.float32

        # ---- conv1 + ReLU:  (m1, 36) @ (36, C1) ----
        a1 = jnp.dot(p1_ref[...], w1_ref[...], preferred_element_type=f32)
        a1 = jnp.maximum(a1 + b1_ref[...], 0.0)                      # (m1, C1)

        # ---- conv2 + ReLU.  In-VMEM im2col of the conv1 activation via
        # constant one-hot gather matrices on the MXU (rows that fall into the
        # zero-padding halo are all-zero rows of G, i.e. implicit zero pad).
        acc2 = jnp.zeros((m2, C2), f32)
        for t in range(NTAP):                                        # static unroll (9)
            patch_t = jnp.dot(g2_ref[t], a1, preferred_element_type=f32)      # (m2, C1)
            acc2 = acc2 + jnp.dot(patch_t, w2_ref[t], preferred_element_type=f32)
        a2 = jnp.maximum(acc2 + b2_ref[...], 0.0)                    # (m2, C2)

        # ---- flatten + fc1 + ReLU.  The NCHW flatten is folded into the fc1
        # weight (v1[s] holds the fc1 weight rows for spatial position s), and
        # E[s] selects rows (b, s) of a2 for every batch element, so nothing
        # is reshaped or transposed inside the kernel.
        y1 = jnp.zeros((batch, NFC1), f32)
        for s in range(NSP2):                                        # static unroll (16)
            rows_s = jnp.dot(e_ref[s], a2, preferred_element_type=f32)        # (B, C2)
            y1 = y1 + jnp.dot(rows_s, v1_ref[s], preferred_element_type=f32)
        y1 = jnp.maximum(y1 + bf1_ref[...], 0.0)                     # (B, NFC1)

        # ---- fc2 + ReLU (last_activation defaults to 'relu') ----
        y2 = jnp.dot(y1, wf2_ref[...], preferred_element_type=f32)
        out_ref[...] = jnp.maximum(y2 + bf2_ref[...], 0.0)

    return kernel


def _full_spec(shape):
    """Whole-array block for the single-invocation grid."""
    n = len(shape)

    def index_map(i):
        return (0,) * n

    return pl.BlockSpec(shape, index_map)


# ----------------------------------------------------------------------------
# Wrapper-side glue (input-side patch build + trace-time constants)
# ----------------------------------------------------------------------------
def _conv1_patches(x_nhwc):
    """im2col for conv1 only (network input).  (B,H0,W0,C0) -> (B*NSP1, K*K*C0)."""
    b = x_nhwc.shape[0]
    xp = jnp.pad(x_nhwc, ((0, 0), (PAD, PAD), (PAD, PAD), (0, 0)))
    cols = []
    for i in range(K):
        for j in range(K):
            cols.append(xp[:, i:i + STRIDE * H1:STRIDE, j:j + STRIDE * W1:STRIDE, :])
    patches = jnp.stack(cols, axis=3)              # (B, H1, W1, K*K, C0)
    return patches.reshape(b * NSP1, K * K * C0)


def _conv2_gather_mats(batch):
    """One-hot matrices: G[t] @ a1 == conv2 im2col tap t (zero padding built in)."""
    g = np.zeros((NTAP, batch * NSP2, batch * NSP1), np.float32)
    for b in range(batch):
        for oh in range(H2):
            for ow in range(W2):
                m = b * NSP2 + oh * W2 + ow
                for i in range(K):
                    for j in range(K):
                        hs = STRIDE * oh + i - PAD
                        ws = STRIDE * ow + j - PAD
                        if 0 <= hs < H1 and 0 <= ws < W1:
                            g[i * K + j, m, b * NSP1 + hs * W1 + ws] = 1.0
    return jnp.asarray(g)


def _flatten_select_mats(batch):
    """E[s] @ a2 == rows (b, s) of a2 for all batch elements b."""
    e = np.zeros((NSP2, batch, batch * NSP2), np.float32)
    for s in range(NSP2):
        for b in range(batch):
            e[s, b, b * NSP2 + s] = 1.0
    return jnp.asarray(e)


# ----------------------------------------------------------------------------
# Parameters: deterministic init (torch layout) + one-time repack for the kernel
# ----------------------------------------------------------------------------
def _glorot_normal(key, shape, fan_in, fan_out):
    std = (2.0 / (fan_in + fan_out)) ** 0.5
    return std * jax.random.normal(key, shape, dtype=jnp.float32)


def init_params(key):
    """Torch-layout params: conv (Cout,Cin,kh,kw), fc (out,in); biases like nn defaults."""
    params = {"conv": [], "fc": []}
    for cin, cout in ((C0, C1), (C1, C2)):
        key, wk, bk = jax.random.split(key, 3)
        fan_in, fan_out = cin * K * K, cout * K * K
        w = _glorot_normal(wk, (cout, cin, K, K), fan_in, fan_out)
        bound = 1.0 / (fan_in ** 0.5)
        b = jax.random.uniform(bk, (cout,), jnp.float32, -bound, bound)
        params["conv"].append((w, b))
    in_features = FLAT
    for fc in (NFC1, NFC2):
        key, wk, bk = jax.random.split(key, 3)
        w = _glorot_normal(wk, (fc, in_features), in_features, fc)
        bound = 1.0 / (in_features ** 0.5)
        b = jax.random.uniform(bk, (fc,), jnp.float32, -bound, bound)
        params["fc"].append((w, b))
        in_features = fc
    return params


def pack_params(params):
    """One-time repack into kernel-ready matrices (no per-call transposes)."""
    (w_c1, b_c1), (w_c2, b_c2) = params["conv"]
    (w_f1, b_f1), (w_f2, b_f2) = params["fc"]
    # conv weights -> (kh, kw, cin, cout), flattened to match the patch order
    w1 = jnp.transpose(w_c1, (2, 3, 1, 0)).reshape(K * K * C0, C1)
    w2 = jnp.transpose(w_c2, (2, 3, 1, 0)).reshape(NTAP, C1, C2)
    # fc1: torch flattens NCHW as c*NSP2 + s; our activation rows are s with
    # channels on lanes  ->  v1[s, c, f] = w_f1[f, c*NSP2 + s]
    v1 = w_f1.T.reshape(C2, NSP2, NFC1).transpose(1, 0, 2)
    return dict(
        w1=w1, b1=b_c1.reshape(1, C1),
        w2=w2, b2=b_c2.reshape(1, C2),
        v1=v1, bf1=b_f1.reshape(1, NFC1),
        wf2=w_f2.T, bf2=b_f2.reshape(1, NFC2),
    )


# ----------------------------------------------------------------------------
# Full forward pass: one fused pallas_call
# ----------------------------------------------------------------------------
@jax.jit
def convnet_forward(x_nchw, packed):
    batch = x_nchw.shape[0]
    x_nhwc = jnp.transpose(x_nchw, (0, 2, 3, 1))     # NCHW -> NHWC
    p1 = _conv1_patches(x_nhwc)                      # (B*64, 36), input-side only

    # Constant gather / selection matrices (trace-time numpy -> baked constants).
    g2 = _conv2_gather_mats(batch)                   # (9, B*16, B*64)
    e = _flatten_select_mats(batch)                  # (16, B, B*16)

    operands = (p1, packed["w1"], packed["b1"],
                g2, packed["w2"], packed["b2"],
                e, packed["v1"], packed["bf1"],
                packed["wf2"], packed["bf2"])

    m1, m2 = batch * NSP1, batch * NSP2
    flops = (2 * m1 * (K * K * C0) * C1
             + NTAP * (2 * m2 * m1 * C1 + 2 * m2 * C1 * C2)
             + NSP2 * (2 * batch * m2 * C2 + 2 * batch * C2 * NFC1)
             + 2 * batch * NFC1 * NFC2)
    bytes_accessed = 4 * (sum(int(np.prod(o.shape)) for o in operands)
                          + batch * NFC2)

    return pl.pallas_call(
        _make_fused_kernel(batch),
        out_shape=jax.ShapeDtypeStruct((batch, NFC2), jnp.float32),
        grid=(1,),
        in_specs=[_full_spec(o.shape) for o in operands],
        out_specs=_full_spec((batch, NFC2)),
        compiler_params=pltpu.CompilerParams(
            dimension_semantics=("arbitrary",)),
        cost_estimate=pl.CostEstimate(
            flops=flops, transcendentals=0, bytes_accessed=bytes_accessed),
    )(*operands)


# ----------------------------------------------------------------------------
# Pure-JAX reference (mirrors the PyTorch module) for a correctness check
# ----------------------------------------------------------------------------
def reference_forward(x_nchw, params):
    x = x_nchw
    for (w, b) in params["conv"]:
        x = jax.lax.conv_general_dilated(
            x, w, window_strides=(STRIDE, STRIDE),
            padding=((PAD, PAD), (PAD, PAD)),
            dimension_numbers=("NCHW", "OIHW", "NCHW"))
        x = jnp.maximum(x + b[None, :, None, None], 0.0)
    x = x.reshape(x.shape[0], -1)                    # torch x.view(B, -1) on NCHW
    for (w, b) in params["fc"]:
        x = jnp.maximum(x @ w.T + b, 0.0)            # relu after every fc (last too)
    return x


if __name__ == "__main__":
    batch = 2
    key = jax.random.PRNGKey(0)
    key, xkey, pkey = jax.random.split(key, 3)
    x = jax.random.normal(xkey, (batch, C0, H0, W0), dtype=jnp.float32)

    params = init_params(pkey)
    packed = pack_params(params)

    out = convnet_forward(x, packed)
    out = jax.block_until_ready(out)

    assert out.shape == (batch, NFC2), out.shape
    assert bool(jnp.all(jnp.isfinite(out)))

    ref = reference_forward(x, params)
    max_err = float(jnp.max(jnp.abs(out - ref)))
    assert bool(jnp.allclose(out, ref, rtol=2e-3, atol=2e-3)), max_err

    print("KERNEL_OK")
</pallas_src>

<mosaic_0001>
module attributes {stable_mosaic.version = 11 : i64} {
  func.func @kernel(%arg0: i32, %arg1: memref<128x36xf32, #tpu.memory_space<vmem>>, %arg2: memref<36x8xf32, #tpu.memory_space<vmem>>, %arg3: memref<1x8xf32, #tpu.memory_space<vmem>>, %arg4: memref<9x32x128xf32, #tpu.memory_space<vmem>>, %arg5: memref<9x8x16xf32, #tpu.memory_space<vmem>>, %arg6: memref<1x16xf32, #tpu.memory_space<vmem>>, %arg7: memref<16x2x32xf32, #tpu.memory_space<vmem>>, %arg8: memref<16x16x32xf32, #tpu.memory_space<vmem>>, %arg9: memref<1x32xf32, #tpu.memory_space<vmem>>, %arg10: memref<32x10xf32, #tpu.memory_space<vmem>>, %arg11: memref<1x10xf32, #tpu.memory_space<vmem>>, %arg12: memref<2x10xf32, #tpu.memory_space<vmem>>) attributes {dimension_semantics = [#tpu.dimension_semantics<arbitrary>], iteration_bounds = array<i64: 1>, scalar_prefetch = 0 : i64, scratch_operands = 0 : i64, tpu.core_type = #tpu.core_type<tc>, window_params = [{pipeline_mode = #tpu.pipeline_mode<synchronous>, transform_indices = @transform_0, window_bounds = array<i64: 128, 36>}, {pipeline_mode = #tpu.pipeline_mode<synchronous>, transform_indices = @transform_1, window_bounds = array<i64: 36, 8>}, {pipeline_mode = #tpu.pipeline_mode<synchronous>, transform_indices = @transform_2, window_bounds = array<i64: 1, 8>}, {pipeline_mode = #tpu.pipeline_mode<synchronous>, transform_indices = @transform_3, window_bounds = array<i64: 9, 32, 128>}, {pipeline_mode = #tpu.pipeline_mode<synchronous>, transform_indices = @transform_4, window_bounds = array<i64: 9, 8, 16>}, {pipeline_mode = #tpu.pipeline_mode<synchronous>, transform_indices = @transform_5, window_bounds = array<i64: 1, 16>}, {pipeline_mode = #tpu.pipeline_mode<synchronous>, transform_indices = @transform_6, window_bounds = array<i64: 16, 2, 32>}, {pipeline_mode = #tpu.pipeline_mode<synchronous>, transform_indices = @transform_7, window_bounds = array<i64: 16, 16, 32>}, {pipeline_mode = #tpu.pipeline_mode<synchronous>, transform_indices = @transform_8, window_bounds = array<i64: 1, 32>}, {pipeline_mode = #tpu.pipeline_mode<synchronous>, transform_indices = @transform_9, window_bounds = array<i64: 32, 10>}, {pipeline_mode = #tpu.pipeline_mode<synchronous>, transform_indices = @transform_10, window_bounds = array<i64: 1, 10>}, {pipeline_mode = #tpu.pipeline_mode<synchronous>, transform_indices = @transform_11, window_bounds = array<i64: 2, 10>}]} {
    %c0 = arith.constant 0 : index
    %c0_0 = arith.constant 0 : index
    %0 = vector.load %arg1[%c0, %c0_0] : memref<128x36xf32, #tpu.memory_space<vmem>>, vector<128x36xf32>
    %c0_1 = arith.constant 0 : index
    %c0_2 = arith.constant 0 : index
    %1 = vector.load %arg2[%c0_1, %c0_2] : memref<36x8xf32, #tpu.memory_space<vmem>>, vector<36x8xf32>
    %cst = arith.constant dense<0.000000e+00> : vector<128x8xf32>
    %2 = tpu.matmul %0, %1, %cst {dimension_numbers = #tpu.dot_dimension_numbers<[1], [0], [0], [1], [0, 0, 1, 1], [], []>} : vector<128x36xf32>, vector<36x8xf32>, vector<128x8xf32> -> vector<128x8xf32>
    %c0_3 = arith.constant 0 : index
    %c0_4 = arith.constant 0 : index
    %3 = vector.load %arg3[%c0_3, %c0_4] : memref<1x8xf32, #tpu.memory_space<vmem>>, vector<1x8xf32>
    %4 = vector.broadcast %3 : vector<1x8xf32> to vector<128x8xf32>
    %5 = arith.addf %2, %4 : vector<128x8xf32>
    %cst_5 = arith.constant 0.000000e+00 : f32
    %6 = vector.broadcast %cst_5 : f32 to vector<128x8xf32>
    %7 = arith.maximumf %5, %6 : vector<128x8xf32>
    %cst_6 = arith.constant 0.000000e+00 : f32
    %8 = vector.broadcast %cst_6 : f32 to vector<32x16xf32>
    %c0_7 = arith.constant 0 : index
    %c0_8 = arith.constant 0 : index
    %c0_9 = arith.constant 0 : index
    %9 = vector.load %arg4[%c0_7, %c0_8, %c0_9] : memref<9x32x128xf32, #tpu.memory_space<vmem>>, vector<1x32x128xf32>
    %10 = vector.shape_cast %9 : vector<1x32x128xf32> to vector<32x128xf32>
    %cst_10 = arith.constant dense<0.000000e+00> : vector<32x8xf32>
    %11 = tpu.matmul %10, %7, %cst_10 {dimension_numbers = #tpu.dot_dimension_numbers<[1], [0], [0], [1], [0, 0, 1, 1], [], []>} : vector<32x128xf32>, vector<128x8xf32>, vector<32x8xf32> -> vector<32x8xf32>
    %c0_11 = arith.constant 0 : index
    %c0_12 = arith.constant 0 : index
    %c0_13 = arith.constant 0 : index
    %12 = vector.load %arg5[%c0_11, %c0_12, %c0_13] : memref<9x8x16xf32, #tpu.memory_space<vmem>>, vector<1x8x16xf32>
    %13 = vector.shape_cast %12 : vector<1x8x16xf32> to vector<8x16xf32>
    %cst_14 = arith.constant dense<0.000000e+00> : vector<32x16xf32>
    %14 = tpu.matmul %11, %13, %cst_14 {dimension_numbers = #tpu.dot_dimension_numbers<[1], [0], [0], [1], [0, 0, 1, 1], [], []>} : vector<32x8xf32>, vector<8x16xf32>, vector<32x16xf32> -> vector<32x16xf32>
    %15 = arith.addf %8, %14 : vector<32x16xf32>
    %c1 = arith.constant 1 : index
    %c0_15 = arith.constant 0 : index
    %c0_16 = arith.constant 0 : index
    %16 = vector.load %arg4[%c1, %c0_15, %c0_16] : memref<9x32x128xf32, #tpu.memory_space<vmem>>, vector<1x32x128xf32>
    %17 = vector.shape_cast %16 : vector<1x32x128xf32> to vector<32x128xf32>
    %cst_17 = arith.constant dense<0.000000e+00> : vector<32x8xf32>
    %18 = tpu.matmul %17, %7, %cst_17 {dimension_numbers = #tpu.dot_dimension_numbers<[1], [0], [0], [1], [0, 0, 1, 1], [], []>} : vector<32x128xf32>, vector<128x8xf32>, vector<32x8xf32> -> vector<32x8xf32>
    %c1_18 = arith.constant 1 : index
    %c0_19 = arith.constant 0 : index
    %c0_20 = arith.constant 0 : index
    %19 = vector.load %arg5[%c1_18, %c0_19, %c0_20] : memref<9x8x16xf32, #tpu.memory_space<vmem>>, vector<1x8x16xf32>
    %20 = vector.shape_cast %19 : vector<1x8x16xf32> to vector<8x16xf32>
    %cst_21 = arith.constant dense<0.000000e+00> : vector<32x16xf32>
    %21 = tpu.matmul %18, %20, %cst_21 {dimension_numbers = #tpu.dot_dimension_numbers<[1], [0], [0], [1], [0, 0, 1, 1], [], []>} : vector<32x8xf32>, vector<8x16xf32>, vector<32x16xf32> -> vector<32x16xf32>
    %22 = arith.addf %15, %21 : vector<32x16xf32>
    %c2 = arith.constant 2 : index
    %c0_22 = arith.constant 0 : index
    %c0_23 = arith.constant 0 : index
    %23 = vector.load %arg4[%c2, %c0_22, %c0_23] : memref<9x32x128xf32, #tpu.memory_space<vmem>>, vector<1x32x128xf32>
    %24 = vector.shape_cast %23 : vector<1x32x128xf32> to vector<32x128xf32>
    %cst_24 = arith.constant dense<0.000000e+00> : vector<32x8xf32>
    %25 = tpu.matmul %24, %7, %cst_24 {dimension_numbers = #tpu.dot_dimension_numbers<[1], [0], [0], [1], [0, 0, 1, 1], [], []>} : vector<32x128xf32>, vector<128x8xf32>, vector<32x8xf32> -> vector<32x8xf32>
    %c2_25 = arith.constant 2 : index
    %c0_26 = arith.constant 0 : index
    %c0_27 = arith.constant 0 : index
    %26 = vector.load %arg5[%c2_25, %c0_26, %c0_27] : memref<9x8x16xf32, #tpu.memory_space<vmem>>, vector<1x8x16xf32>
    %27 = vector.shape_cast %26 : vector<1x8x16xf32> to vector<8x16xf32>
    %cst_28 = arith.constant dense<0.000000e+00> : vector<32x16xf32>
    %28 = tpu.matmul %25, %27, %cst_28 {dimension_numbers = #tpu.dot_dimension_numbers<[1], [0], [0], [1], [0, 0, 1, 1], [], []>} : vector<32x8xf32>, vector<8x16xf32>, vector<32x16xf32> -> vector<32x16xf32>
    %29 = arith.addf %22, %28 : vector<32x16xf32>
    %c3 = arith.constant 3 : index
    %c0_29 = arith.constant 0 : index
    %c0_30 = arith.constant 0 : index
    %30 = vector.load %arg4[%c3, %c0_29, %c0_30] : memref<9x32x128xf32, #tpu.memory_space<vmem>>, vector<1x32x128xf32>
    %31 = vector.shape_cast %30 : vector<1x32x128xf32> to vector<32x128xf32>
    %cst_31 = arith.constant dense<0.000000e+00> : vector<32x8xf32>
    %32 = tpu.matmul %31, %7, %cst_31 {dimension_numbers = #tpu.dot_dimension_numbers<[1], [0], [0], [1], [0, 0, 1, 1], [], []>} : vector<32x128xf32>, vector<128x8xf32>, vector<32x8xf32> -> vector<32x8xf32>
    %c3_32 = arith.constant 3 : index
    %c0_33 = arith.constant 0 : index
    %c0_34 = arith.constant 0 : index
    %33 = vector.load %arg5[%c3_32, %c0_33, %c0_34] : memref<9x8x16xf32, #tpu.memory_space<vmem>>, vector<1x8x16xf32>
    %34 = vector.shape_cast %33 : vector<1x8x16xf32> to vector<8x16xf32>
    %cst_35 = arith.constant dense<0.000000e+00> : vector<32x16xf32>
    %35 = tpu.matmul %32, %34, %cst_35 {dimension_numbers = #tpu.dot_dimension_numbers<[1], [0], [0], [1], [0, 0, 1, 1], [], []>} : vector<32x8xf32>, vector<8x16xf32>, vector<32x16xf32> -> vector<32x16xf32>
    %36 = arith.addf %29, %35 : vector<32x16xf32>
    %c4 = arith.constant 4 : index
    %c0_36 = arith.constant 0 : index
    %c0_37 = arith.constant 0 : index
    %37 = vector.load %arg4[%c4, %c0_36, %c0_37] : memref<9x32x128xf32, #tpu.memory_space<vmem>>, vector<1x32x128xf32>
    %38 = vector.shape_cast %37 : vector<1x32x128xf32> to vector<32x128xf32>
    %cst_38 = arith.constant dense<0.000000e+00> : vector<32x8xf32>
    %39 = tpu.matmul %38, %7, %cst_38 {dimension_numbers = #tpu.dot_dimension_numbers<[1], [0], [0], [1], [0, 0, 1, 1], [], []>} : vector<32x128xf32>, vector<128x8xf32>, vector<32x8xf32> -> vector<32x8xf32>
    %c4_39 = arith.constant 4 : index
    %c0_40 = arith.constant 0 : index
    %c0_41 = arith.constant 0 : index
    %40 = vector.load %arg5[%c4_39, %c0_40, %c0_41] : memref<9x8x16xf32, #tpu.memory_space<vmem>>, vector<1x8x16xf32>
    %41 = vector.shape_cast %40 : vector<1x8x16xf32> to vector<8x16xf32>
    %cst_42 = arith.constant dense<0.000000e+00> : vector<32x16xf32>
    %42 = tpu.matmul %39, %41, %cst_42 {dimension_numbers = #tpu.dot_dimension_numbers<[1], [0], [0], [1], [0, 0, 1, 1], [], []>} : vector<32x8xf32>, vector<8x16xf32>, vector<32x16xf32> -> vector<32x16xf32>
    %43 = arith.addf %36, %42 : vector<32x16xf32>
    %c5 = arith.constant 5 : index
    %c0_43 = arith.constant 0 : index
    %c0_44 = arith.constant 0 : index
    %44 = vector.load %arg4[%c5, %c0_43, %c0_44] : memref<9x32x128xf32, #tpu.memory_space<vmem>>, vector<1x32x128xf32>
    %45 = vector.shape_cast %44 : vector<1x32x128xf32> to vector<32x128xf32>
    %cst_45 = arith.constant dense<0.000000e+00> : vector<32x8xf32>
    %46 = tpu.matmul %45, %7, %cst_45 {dimension_numbers = #tpu.dot_dimension_numbers<[1], [0], [0], [1], [0, 0, 1, 1], [], []>} : vector<32x128xf32>, vector<128x8xf32>, vector<32x8xf32> -> vector<32x8xf32>
    %c5_46 = arith.constant 5 : index
    %c0_47 = arith.constant 0 : index
    %c0_48 = arith.constant 0 : index
    %47 = vector.load %arg5[%c5_46, %c0_47, %c0_48] : memref<9x8x16xf32, #tpu.memory_space<vmem>>, vector<1x8x16xf32>
    %48 = vector.shape_cast %47 : vector<1x8x16xf32> to vector<8x16xf32>
    %cst_49 = arith.constant dense<0.000000e+00> : vector<32x16xf32>
    %49 = tpu.matmul %46, %48, %cst_49 {dimension_numbers = #tpu.dot_dimension_numbers<[1], [0], [0], [1], [0, 0, 1, 1], [], []>} : vector<32x8xf32>, vector<8x16xf32>, vector<32x16xf32> -> vector<32x16xf32>
    %50 = arith.addf %43, %49 : vector<32x16xf32>
    %c6 = arith.constant 6 : index
    %c0_50 = arith.constant 0 : index
    %c0_51 = arith.constant 0 : index
    %51 = vector.load %arg4[%c6, %c0_50, %c0_51] : memref<9x32x128xf32, #tpu.memory_space<vmem>>, vector<1x32x128xf32>
    %52 = vector.shape_cast %51 : vector<1x32x128xf32> to vector<32x128xf32>
    %cst_52 = arith.constant dense<0.000000e+00> : vector<32x8xf32>
    %53 = tpu.matmul %52, %7, %cst_52 {dimension_numbers = #tpu.dot_dimension_numbers<[1], [0], [0], [1], [0, 0, 1, 1], [], []>} : vector<32x128xf32>, vector<128x8xf32>, vector<32x8xf32> -> vector<32x8xf32>
    %c6_53 = arith.constant 6 : index
    %c0_54 = arith.constant 0 : index
    %c0_55 = arith.constant 0 : index
    %54 = vector.load %arg5[%c6_53, %c0_54, %c0_55] : memref<9x8x16xf32, #tpu.memory_space<vmem>>, vector<1x8x16xf32>
    %55 = vector.shape_cast %54 : vector<1x8x16xf32> to vector<8x16xf32>
    %cst_56 = arith.constant dense<0.000000e+00> : vector<32x16xf32>
    %56 = tpu.matmul %53, %55, %cst_56 {dimension_numbers = #tpu.dot_dimension_numbers<[1], [0], [0], [1], [0, 0, 1, 1], [], []>} : vector<32x8xf32>, vector<8x16xf32>, vector<32x16xf32> -> vector<32x16xf32>
    %57 = arith.addf %50, %56 : vector<32x16xf32>
    %c7 = arith.constant 7 : index
    %c0_57 = arith.constant 0 : index
    %c0_58 = arith.constant 0 : index
    %58 = vector.load %arg4[%c7, %c0_57, %c0_58] : memref<9x32x128xf32, #tpu.memory_space<vmem>>, vector<1x32x128xf32>
    %59 = vector.shape_cast %58 : vector<1x32x128xf32> to vector<32x128xf32>
    %cst_59 = arith.constant dense<0.000000e+00> : vector<32x8xf32>
    %60 = tpu.matmul %59, %7, %cst_59 {dimension_numbers = #tpu.dot_dimension_numbers<[1], [0], [0], [1], [0, 0, 1, 1], [], []>} : vector<32x128xf32>, vector<128x8xf32>, vector<32x8xf32> -> vector<32x8xf32>
    %c7_60 = arith.constant 7 : index
    %c0_61 = arith.constant 0 : index
    %c0_62 = arith.constant 0 : index
    %61 = vector.load %arg5[%c7_60, %c0_61, %c0_62] : memref<9x8x16xf32, #tpu.memory_space<vmem>>, vector<1x8x16xf32>
    %62 = vector.shape_cast %61 : vector<1x8x16xf32> to vector<8x16xf32>
    %cst_63 = arith.constant dense<0.000000e+00> : vector<32x16xf32>
    %63 = tpu.matmul %60, %62, %cst_63 {dimension_numbers = #tpu.dot_dimension_numbers<[1], [0], [0], [1], [0, 0, 1, 1], [], []>} : vector<32x8xf32>, vector<8x16xf32>, vector<32x16xf32> -> vector<32x16xf32>
    %64 = arith.addf %57, %63 : vector<32x16xf32>
    %c8 = arith.constant 8 : index
    %c0_64 = arith.constant 0 : index
    %c0_65 = arith.constant 0 : index
    %65 = vector.load %arg4[%c8, %c0_64, %c0_65] : memref<9x32x128xf32, #tpu.memory_space<vmem>>, vector<1x32x128xf32>
    %66 = vector.shape_cast %65 : vector<1x32x128xf32> to vector<32x128xf32>
    %cst_66 = arith.constant dense<0.000000e+00> : vector<32x8xf32>
    %67 = tpu.matmul %66, %7, %cst_66 {dimension_numbers = #tpu.dot_dimension_numbers<[1], [0], [0], [1], [0, 0, 1, 1], [], []>} : vector<32x128xf32>, vector<128x8xf32>, vector<32x8xf32> -> vector<32x8xf32>
    %c8_67 = arith.constant 8 : index
    %c0_68 = arith.constant 0 : index
    %c0_69 = arith.constant 0 : index
    %68 = vector.load %arg5[%c8_67, %c0_68, %c0_69] : memref<9x8x16xf32, #tpu.memory_space<vmem>>, vector<1x8x16xf32>
    %69 = vector.shape_cast %68 : vector<1x8x16xf32> to vector<8x16xf32>
    %cst_70 = arith.constant dense<0.000000e+00> : vector<32x16xf32>
    %70 = tpu.matmul %67, %69, %cst_70 {dimension_numbers = #tpu.dot_dimension_numbers<[1], [0], [0], [1], [0, 0, 1, 1], [], []>} : vector<32x8xf32>, vector<8x16xf32>, vector<32x16xf32> -> vector<32x16xf32>
    %71 = arith.addf %64, %70 : vector<32x16xf32>
    %c0_71 = arith.constant 0 : index
    %c0_72 = arith.constant 0 : index
    %72 = vector.load %arg6[%c0_71, %c0_72] : memref<1x16xf32, #tpu.memory_space<vmem>>, vector<1x16xf32>
    %73 = vector.broadcast %72 : vector<1x16xf32> to vector<32x16xf32>
    %74 = arith.addf %71, %73 : vector<32x16xf32>
    %cst_73 = arith.constant 0.000000e+00 : f32
    %75 = vector.broadcast %cst_73 : f32 to vector<32x16xf32>
    %76 = arith.maximumf %74, %75 : vector<32x16xf32>
    %cst_74 = arith.constant 0.000000e+00 : f32
    %77 = vector.broadcast %cst_74 : f32 to vector<2x32xf32>
    %c0_75 = arith.constant 0 : index
    %c0_76 = arith.constant 0 : index
    %c0_77 = arith.constant 0 : index
    %78 = vector.load %arg7[%c0_75, %c0_76, %c0_77] : memref<16x2x32xf32, #tpu.memory_space<vmem>>, vector<1x2x32xf32>
    %79 = vector.shape_cast %78 : vector<1x2x32xf32> to vector<2x32xf32>
    %cst_78 = arith.constant dense<0.000000e+00> : vector<2x16xf32>
    %80 = tpu.matmul %79, %76, %cst_78 {dimension_numbers = #tpu.dot_dimension_numbers<[1], [0], [0], [1], [0, 0, 1, 1], [], []>} : vector<2x32xf32>, vector<32x16xf32>, vector<2x16xf32> -> vector<2x16xf32>
    %c0_79 = arith.constant 0 : index
    %c0_80 = arith.constant 0 : index
    %c0_81 = arith.constant 0 : index
    %81 = vector.load %arg8[%c0_79, %c0_80, %c0_81] : memref<16x16x32xf32, #tpu.memory_space<vmem>>, vector<1x16x32xf32>
    %82 = vector.shape_cast %81 : vector<1x16x32xf32> to vector<16x32xf32>
    %cst_82 = arith.constant dense<0.000000e+00> : vector<2x32xf32>
    %83 = tpu.matmul %80, %82, %cst_82 {dimension_numbers = #tpu.dot_dimension_numbers<[1], [0], [0], [1], [0, 0, 1, 1], [], []>} : vector<2x16xf32>, vector<16x32xf32>, vector<2x32xf32> -> vector<2x32xf32>
    %84 = arith.addf %77, %83 : vector<2x32xf32>
    %c1_83 = arith.constant 1 : index
    %c0_84 = arith.constant 0 : index
    %c0_85 = arith.constant 0 : index
    %85 = vector.load %arg7[%c1_83, %c0_84, %c0_85] : memref<16x2x32xf32, #tpu.memory_space<vmem>>, vector<1x2x32xf32>
    %86 = vector.shape_cast %85 : vector<1x2x32xf32> to vector<2x32xf32>
    %cst_86 = arith.constant dense<0.000000e+00> : vector<2x16xf32>
    %87 = tpu.matmul %86, %76, %cst_86 {dimension_numbers = #tpu.dot_dimension_numbers<[1], [0], [0], [1], [0, 0, 1, 1], [], []>} : vector<2x32xf32>, vector<32x16xf32>, vector<2x16xf32> -> vector<2x16xf32>
    %c1_87 = arith.constant 1 : index
    %c0_88 = arith.constant 0 : index
    %c0_89 = arith.constant 0 : index
    %88 = vector.load %arg8[%c1_87, %c0_88, %c0_89] : memref<16x16x32xf32, #tpu.memory_space<vmem>>, vector<1x16x32xf32>
    %89 = vector.shape_cast %88 : vector<1x16x32xf32> to vector<16x32xf32>
    %cst_90 = arith.constant dense<0.000000e+00> : vector<2x32xf32>
    %90 = tpu.matmul %87, %89, %cst_90 {dimension_numbers = #tpu.dot_dimension_numbers<[1], [0], [0], [1], [0, 0, 1, 1], [], []>} : vector<2x16xf32>, vector<16x32xf32>, vector<2x32xf32> -> vector<2x32xf32>
    %91 = arith.addf %84, %90 : vector<2x32xf32>
    %c2_91 = arith.constant 2 : index
    %c0_92 = arith.constant 0 : index
    %c0_93 = arith.constant 0 : index
    %92 = vector.load %arg7[%c2_91, %c0_92, %c0_93] : memref<16x2x32xf32, #tpu.memory_space<vmem>>, vector<1x2x32xf32>
    %93 = vector.shape_cast %92 : vector<1x2x32xf32> to vector<2x32xf32>
    %cst_94 = arith.constant dense<0.000000e+00> : vector<2x16xf32>
    %94 = tpu.matmul %93, %76, %cst_94 {dimension_numbers = #tpu.dot_dimension_numbers<[1], [0], [0], [1], [0, 0, 1, 1], [], []>} : vector<2x32xf32>, vector<32x16xf32>, vector<2x16xf32> -> vector<2x16xf32>
    %c2_95 = arith.constant 2 : index
    %c0_96 = arith.constant 0 : index
    %c0_97 = arith.constant 0 : index
    %95 = vector.load %arg8[%c2_95, %c0_96, %c0_97] : memref<16x16x32xf32, #tpu.memory_space<vmem>>, vector<1x16x32xf32>
    %96 = vector.shape_cast %95 : vector<1x16x32xf32> to vector<16x32xf32>
    %cst_98 = arith.constant dense<0.000000e+00> : vector<2x32xf32>
    %97 = tpu.matmul %94, %96, %cst_98 {dimension_numbers = #tpu.dot_dimension_numbers<[1], [0], [0], [1], [0, 0, 1, 1], [], []>} : vector<2x16xf32>, vector<16x32xf32>, vector<2x32xf32> -> vector<2x32xf32>
    %98 = arith.addf %91, %97 : vector<2x32xf32>
    %c3_99 = arith.constant 3 : index
    %c0_100 = arith.constant 0 : index
    %c0_101 = arith.constant 0 : index
    %99 = vector.load %arg7[%c3_99, %c0_100, %c0_101] : memref<16x2x32xf32, #tpu.memory_space<vmem>>, vector<1x2x32xf32>
    %100 = vector.shape_cast %99 : vector<1x2x32xf32> to vector<2x32xf32>
    %cst_102 = arith.constant dense<0.000000e+00> : vector<2x16xf32>
    %101 = tpu.matmul %100, %76, %cst_102 {dimension_numbers = #tpu.dot_dimension_numbers<[1], [0], [0], [1], [0, 0, 1, 1], [], []>} : vector<2x32xf32>, vector<32x16xf32>, vector<2x16xf32> -> vector<2x16xf32>
    %c3_103 = arith.constant 3 : index
    %c0_104 = arith.constant 0 : index
    %c0_105 = arith.constant 0 : index
    %102 = vector.load %arg8[%c3_103, %c0_104, %c0_105] : memref<16x16x32xf32, #tpu.memory_space<vmem>>, vector<1x16x32xf32>
    %103 = vector.shape_cast %102 : vector<1x16x32xf32> to vector<16x32xf32>
    %cst_106 = arith.constant dense<0.000000e+00> : vector<2x32xf32>
    %104 = tpu.matmul %101, %103, %cst_106 {dimension_numbers = #tpu.dot_dimension_numbers<[1], [0], [0], [1], [0, 0, 1, 1], [], []>} : vector<2x16xf32>, vector<16x32xf32>, vector<2x32xf32> -> vector<2x32xf32>
    %105 = arith.addf %98, %104 : vector<2x32xf32>
    %c4_107 = arith.constant 4 : index
    %c0_108 = arith.constant 0 : index
    %c0_109 = arith.constant 0 : index
    %106 = vector.load %arg7[%c4_107, %c0_108, %c0_109] : memref<16x2x32xf32, #tpu.memory_space<vmem>>, vector<1x2x32xf32>
    %107 = vector.shape_cast %106 : vector<1x2x32xf32> to vector<2x32xf32>
    %cst_110 = arith.constant dense<0.000000e+00> : vector<2x16xf32>
    %108 = tpu.matmul %107, %76, %cst_110 {dimension_numbers = #tpu.dot_dimension_numbers<[1], [0], [0], [1], [0, 0, 1, 1], [], []>} : vector<2x32xf32>, vector<32x16xf32>, vector<2x16xf32> -> vector<2x16xf32>
    %c4_111 = arith.constant 4 : index
    %c0_112 = arith.constant 0 : index
    %c0_113 = arith.constant 0 : index
    %109 = vector.load %arg8[%c4_111, %c0_112, %c0_113] : memref<16x16x32xf32, #tpu.memory_space<vmem>>, vector<1x16x32xf32>
    %110 = vector.shape_cast %109 : vector<1x16x32xf32> to vector<16x32xf32>
    %cst_114 = arith.constant dense<0.000000e+00> : vector<2x32xf32>
    %111 = tpu.matmul %108, %110, %cst_114 {dimension_numbers = #tpu.dot_dimension_numbers<[1], [0], [0], [1], [0, 0, 1, 1], [], []>} : vector<2x16xf32>, vector<16x32xf32>, vector<2x32xf32> -> vector<2x32xf32>
    %112 = arith.addf %105, %111 : vector<2x32xf32>
    %c5_115 = arith.constant 5 : index
    %c0_116 = arith.constant 0 : index
    %c0_117 = arith.constant 0 : index
    %113 = vector.load %arg7[%c5_115, %c0_116, %c0_117] : memref<16x2x32xf32, #tpu.memory_space<vmem>>, vector<1x2x32xf32>
    %114 = vector.shape_cast %113 : vector<1x2x32xf32> to vector<2x32xf32>
    %cst_118 = arith.constant dense<0.000000e+00> : vector<2x16xf32>
    %115 = tpu.matmul %114, %76, %cst_118 {dimension_numbers = #tpu.dot_dimension_numbers<[1], [0], [0], [1], [0, 0, 1, 1], [], []>} : vector<2x32xf32>, vector<32x16xf32>, vector<2x16xf32> -> vector<2x16xf32>
    %c5_119 = arith.constant 5 : index
    %c0_120 = arith.constant 0 : index
    %c0_121 = arith.constant 0 : index
    %116 = vector.load %arg8[%c5_119, %c0_120, %c0_121] : memref<16x16x32xf32, #tpu.memory_space<vmem>>, vector<1x16x32xf32>
    %117 = vector.shape_cast %116 : vector<1x16x32xf32> to vector<16x32xf32>
    %cst_122 = arith.constant dense<0.000000e+00> : vector<2x32xf32>
    %118 = tpu.matmul %115, %117, %cst_122 {dimension_numbers = #tpu.dot_dimension_numbers<[1], [0], [0], [1], [0, 0, 1, 1], [], []>} : vector<2x16xf32>, vector<16x32xf32>, vector<2x32xf32> -> vector<2x32xf32>
    %119 = arith.addf %112, %118 : vector<2x32xf32>
    %c6_123 = arith.constant 6 : index
    %c0_124 = arith.constant 0 : index
    %c0_125 = arith.constant 0 : index
    %120 = vector.load %arg7[%c6_123, %c0_124, %c0_125] : memref<16x2x32xf32, #tpu.memory_space<vmem>>, vector<1x2x32xf32>
    %121 = vector.shape_cast %120 : vector<1x2x32xf32> to vector<2x32xf32>
    %cst_126 = arith.constant dense<0.000000e+00> : vector<2x16xf32>
    %122 = tpu.matmul %121, %76, %cst_126 {dimension_numbers = #tpu.dot_dimension_numbers<[1], [0], [0], [1], [0, 0, 1, 1], [], []>} : vector<2x32xf32>, vector<32x16xf32>, vector<2x16xf32> -> vector<2x16xf32>
    %c6_127 = arith.constant 6 : index
    %c0_128 = arith.constant 0 : index
    %c0_129 = arith.constant 0 : index
    %123 = vector.load %arg8[%c6_127, %c0_128, %c0_129] : memref<16x16x32xf32, #tpu.memory_space<vmem>>, vector<1x16x32xf32>
    %124 = vector.shape_cast %123 : vector<1x16x32xf32> to vector<16x32xf32>
    %cst_130 = arith.constant dense<0.000000e+00> : vector<2x32xf32>
    %125 = tpu.matmul %122, %124, %cst_130 {dimension_numbers = #tpu.dot_dimension_numbers<[1], [0], [0], [1], [0, 0, 1, 1], [], []>} : vector<2x16xf32>, vector<16x32xf32>, vector<2x32xf32> -> vector<2x32xf32>
    %126 = arith.addf %119, %125 : vector<2x32xf32>
    %c7_131 = arith.constant 7 : index
    %c0_132 = arith.constant 0 : index
    %c0_133 = arith.constant 0 : index
    %127 = vector.load %arg7[%c7_131, %c0_132, %c0_133] : memref<16x2x32xf32, #tpu.memory_space<vmem>>, vector<1x2x32xf32>
    %128 = vector.shape_cast %127 : vector<1x2x32xf32> to vector<2x32xf32>
    %cst_134 = arith.constant dense<0.000000e+00> : vector<2x16xf32>
    %129 = tpu.matmul %128, %76, %cst_134 {dimension_numbers = #tpu.dot_dimension_numbers<[1], [0], [0], [1], [0, 0, 1, 1], [], []>} : vector<2x32xf32>, vector<32x16xf32>, vector<2x16xf32> -> vector<2x16xf32>
    %c7_135 = arith.constant 7 : index
    %c0_136 = arith.constant 0 : index
    %c0_137 = arith.constant 0 : index
    %130 = vector.load %arg8[%c7_135, %c0_136, %c0_137] : memref<16x16x32xf32, #tpu.memory_space<vmem>>, vector<1x16x32xf32>
    %131 = vector.shape_cast %130 : vector<1x16x32xf32> to vector<16x32xf32>
    %cst_138 = arith.constant dense<0.000000e+00> : vector<2x32xf32>
    %132 = tpu.matmul %129, %131, %cst_138 {dimension_numbers = #tpu.dot_dimension_numbers<[1], [0], [0], [1], [0, 0, 1, 1], [], []>} : vector<2x16xf32>, vector<16x32xf32>, vector<2x32xf32> -> vector<2x32xf32>
    %133 = arith.addf %126, %132 : vector<2x32xf32>
    %c8_139 = arith.constant 8 : index
    %c0_140 = arith.constant 0 : index
    %c0_141 = arith.constant 0 : index
    %134 = vector.load %arg7[%c8_139, %c0_140, %c0_141] : memref<16x2x32xf32, #tpu.memory_space<vmem>>, vector<1x2x32xf32>
    %135 = vector.shape_cast %134 : vector<1x2x32xf32> to vector<2x32xf32>
    %cst_142 = arith.constant dense<0.000000e+00> : vector<2x16xf32>
    %136 = tpu.matmul %135, %76, %cst_142 {dimension_numbers = #tpu.dot_dimension_numbers<[1], [0], [0], [1], [0, 0, 1, 1], [], []>} : vector<2x32xf32>, vector<32x16xf32>, vector<2x16xf32> -> vector<2x16xf32>
    %c8_143 = arith.constant 8 : index
    %c0_144 = arith.constant 0 : index
    %c0_145 = arith.constant 0 : index
    %137 = vector.load %arg8[%c8_143, %c0_144, %c0_145] : memref<16x16x32xf32, #tpu.memory_space<vmem>>, vector<1x16x32xf32>
    %138 = vector.shape_cast %137 : vector<1x16x32xf32> to vector<16x32xf32>
    %cst_146 = arith.constant dense<0.000000e+00> : vector<2x32xf32>
    %139 = tpu.matmul %136, %138, %cst_146 {dimension_numbers = #tpu.dot_dimension_numbers<[1], [0], [0], [1], [0, 0, 1, 1], [], []>} : vector<2x16xf32>, vector<16x32xf32>, vector<2x32xf32> -> vector<2x32xf32>
    %140 = arith.addf %133, %139 : vector<2x32xf32>
    %c9 = arith.constant 9 : index
    %c0_147 = arith.constant 0 : index
    %c0_148 = arith.constant 0 : index
    %141 = vector.load %arg7[%c9, %c0_147, %c0_148] : memref<16x2x32xf32, #tpu.memory_space<vmem>>, vector<1x2x32xf32>
    %142 = vector.shape_cast %141 : vector<1x2x32xf32> to vector<2x32xf32>
    %cst_149 = arith.constant dense<0.000000e+00> : vector<2x16xf32>
    %143 = tpu.matmul %142, %76, %cst_149 {dimension_numbers = #tpu.dot_dimension_numbers<[1], [0], [0], [1], [0, 0, 1, 1], [], []>} : vector<2x32xf32>, vector<32x16xf32>, vector<2x16xf32> -> vector<2x16xf32>
    %c9_150 = arith.constant 9 : index
    %c0_151 = arith.constant 0 : index
    %c0_152 = arith.constant 0 : index
    %144 = vector.load %arg8[%c9_150, %c0_151, %c0_152] : memref<16x16x32xf32, #tpu.memory_space<vmem>>, vector<1x16x32xf32>
    %145 = vector.shape_cast %144 : vector<1x16x32xf32> to vector<16x32xf32>
    %cst_153 = arith.constant dense<0.000000e+00> : vector<2x32xf32>
    %146 = tpu.matmul %143, %145, %cst_153 {dimension_numbers = #tpu.dot_dimension_numbers<[1], [0], [0], [1], [0, 0, 1, 1], [], []>} : vector<2x16xf32>, vector<16x32xf32>, vector<2x32xf32> -> vector<2x32xf32>
    %147 = arith.addf %140, %146 : vector<2x32xf32>
    %c10 = arith.constant 10 : index
    %c0_154 = arith.constant 0 : index
    %c0_155 = arith.constant 0 : index
    %148 = vector.load %arg7[%c10, %c0_154, %c0_155] : memref<16x2x32xf32, #tpu.memory_space<vmem>>, vector<1x2x32xf32>
    %149 = vector.shape_cast %148 : vector<1x2x32xf32> to vector<2x32xf32>
    %cst_156 = arith.constant dense<0.000000e+00> : vector<2x16xf32>
    %150 = tpu.matmul %149, %76, %cst_156 {dimension_numbers = #tpu.dot_dimension_numbers<[1], [0], [0], [1], [0, 0, 1, 1], [], []>} : vector<2x32xf32>, vector<32x16xf32>, vector<2x16xf32> -> vector<2x16xf32>
    %c10_157 = arith.constant 10 : index
    %c0_158 = arith.constant 0 : index
    %c0_159 = arith.constant 0 : index
    %151 = vector.load %arg8[%c10_157, %c0_158, %c0_159] : memref<16x16x32xf32, #tpu.memory_space<vmem>>, vector<1x16x32xf32>
    %152 = vector.shape_cast %151 : vector<1x16x32xf32> to vector<16x32xf32>
    %cst_160 = arith.constant dense<0.000000e+00> : vector<2x32xf32>
    %153 = tpu.matmul %150, %152, %cst_160 {dimension_numbers = #tpu.dot_dimension_numbers<[1], [0], [0], [1], [0, 0, 1, 1], [], []>} : vector<2x16xf32>, vector<16x32xf32>, vector<2x32xf32> -> vector<2x32xf32>
    %154 = arith.addf %147, %153 : vector<2x32xf32>
    %c11 = arith.constant 11 : index
    %c0_161 = arith.constant 0 : index
    %c0_162 = arith.constant 0 : index
    %155 = vector.load %arg7[%c11, %c0_161, %c0_162] : memref<16x2x32xf32, #tpu.memory_space<vmem>>, vector<1x2x32xf32>
    %156 = vector.shape_cast %155 : vector<1x2x32xf32> to vector<2x32xf32>
    %cst_163 = arith.constant dense<0.000000e+00> : vector<2x16xf32>
    %157 = tpu.matmul %156, %76, %cst_163 {dimension_numbers = #tpu.dot_dimension_numbers<[1], [0], [0], [1], [0, 0, 1, 1], [], []>} : vector<2x32xf32>, vector<32x16xf32>, vector<2x16xf32> -> vector<2x16xf32>
    %c11_164 = arith.constant 11 : index
    %c0_165 = arith.constant 0 : index
    %c0_166 = arith.constant 0 : index
    %158 = vector.load %arg8[%c11_164, %c0_165, %c0_166] : memref<16x16x32xf32, #tpu.memory_space<vmem>>, vector<1x16x32xf32>
    %159 = vector.shape_cast %158 : vector<1x16x32xf32> to vector<16x32xf32>
    %cst_167 = arith.constant dense<0.000000e+00> : vector<2x32xf32>
    %160 = tpu.matmul %157, %159, %cst_167 {dimension_numbers = #tpu.dot_dimension_numbers<[1], [0], [0], [1], [0, 0, 1, 1], [], []>} : vector<2x16xf32>, vector<16x32xf32>, vector<2x32xf32> -> vector<2x32xf32>
    %161 = arith.addf %154, %160 : vector<2x32xf32>
    %c12 = arith.constant 12 : index
    %c0_168 = arith.constant 0 : index
    %c0_169 = arith.constant 0 : index
    %162 = vector.load %arg7[%c12, %c0_168, %c0_169] : memref<16x2x32xf32, #tpu.memory_space<vmem>>, vector<1x2x32xf32>
    %163 = vector.shape_cast %162 : vector<1x2x32xf32> to vector<2x32xf32>
    %cst_170 = arith.constant dense<0.000000e+00> : vector<2x16xf32>
    %164 = tpu.matmul %163, %76, %cst_170 {dimension_numbers = #tpu.dot_dimension_numbers<[1], [0], [0], [1], [0, 0, 1, 1], [], []>} : vector<2x32xf32>, vector<32x16xf32>, vector<2x16xf32> -> vector<2x16xf32>
    %c12_171 = arith.constant 12 : index
    %c0_172 = arith.constant 0 : index
    %c0_173 = arith.constant 0 : index
    %165 = vector.load %arg8[%c12_171, %c0_172, %c0_173] : memref<16x16x32xf32, #tpu.memory_space<vmem>>, vector<1x16x32xf32>
    %166 = vector.shape_cast %165 : vector<1x16x32xf32> to vector<16x32xf32>
    %cst_174 = arith.constant dense<0.000000e+00> : vector<2x32xf32>
    %167 = tpu.matmul %164, %166, %cst_174 {dimension_numbers = #tpu.dot_dimension_numbers<[1], [0], [0], [1], [0, 0, 1, 1], [], []>} : vector<2x16xf32>, vector<16x32xf32>, vector<2x32xf32> -> vector<2x32xf32>
    %168 = arith.addf %161, %167 : vector<2x32xf32>
    %c13 = arith.constant 13 : index
    %c0_175 = arith.constant 0 : index
    %c0_176 = arith.constant 0 : index
    %169 = vector.load %arg7[%c13, %c0_175, %c0_176] : memref<16x2x32xf32, #tpu.memory_space<vmem>>, vector<1x2x32xf32>
    %170 = vector.shape_cast %169 : vector<1x2x32xf32> to vector<2x32xf32>
    %cst_177 = arith.constant dense<0.000000e+00> : vector<2x16xf32>
    %171 = tpu.matmul %170, %76, %cst_177 {dimension_numbers = #tpu.dot_dimension_numbers<[1], [0], [0], [1], [0, 0, 1, 1], [], []>} : vector<2x32xf32>, vector<32x16xf32>, vector<2x16xf32> -> vector<2x16xf32>
    %c13_178 = arith.constant 13 : index
    %c0_179 = arith.constant 0 : index
    %c0_180 = arith.constant 0 : index
    %172 = vector.load %arg8[%c13_178, %c0_179, %c0_180] : memref<16x16x32xf32, #tpu.memory_space<vmem>>, vector<1x16x32xf32>
    %173 = vector.shape_cast %172 : vector<1x16x32xf32> to vector<16x32xf32>
    %cst_181 = arith.constant dense<0.000000e+00> : vector<2x32xf32>
    %174 = tpu.matmul %171, %173, %cst_181 {dimension_numbers = #tpu.dot_dimension_numbers<[1], [0], [0], [1], [0, 0, 1, 1], [], []>} : vector<2x16xf32>, vector<16x32xf32>, vector<2x32xf32> -> vector<2x32xf32>
    %175 = arith.addf %168, %174 : vector<2x32xf32>
    %c14 = arith.constant 14 : index
    %c0_182 = arith.constant 0 : index
    %c0_183 = arith.constant 0 : index
    %176 = vector.load %arg7[%c14, %c0_182, %c0_183] : memref<16x2x32xf32, #tpu.memory_space<vmem>>, vector<1x2x32xf32>
    %177 = vector.shape_cast %176 : vector<1x2x32xf32> to vector<2x32xf32>
    %cst_184 = arith.constant dense<0.000000e+00> : vector<2x16xf32>
    %178 = tpu.matmul %177, %76, %cst_184 {dimension_numbers = #tpu.dot_dimension_numbers<[1], [0], [0], [1], [0, 0, 1, 1], [], []>} : vector<2x32xf32>, vector<32x16xf32>, vector<2x16xf32> -> vector<2x16xf32>
    %c14_185 = arith.constant 14 : index
    %c0_186 = arith.constant 0 : index
    %c0_187 = arith.constant 0 : index
    %179 = vector.load %arg8[%c14_185, %c0_186, %c0_187] : memref<16x16x32xf32, #tpu.memory_space<vmem>>, vector<1x16x32xf32>
    %180 = vector.shape_cast %179 : vector<1x16x32xf32> to vector<16x32xf32>
    %cst_188 = arith.constant dense<0.000000e+00> : vector<2x32xf32>
    %181 = tpu.matmul %178, %180, %cst_188 {dimension_numbers = #tpu.dot_dimension_numbers<[1], [0], [0], [1], [0, 0, 1, 1], [], []>} : vector<2x16xf32>, vector<16x32xf32>, vector<2x32xf32> -> vector<2x32xf32>
    %182 = arith.addf %175, %181 : vector<2x32xf32>
    %c15 = arith.constant 15 : index
    %c0_189 = arith.constant 0 : index
    %c0_190 = arith.constant 0 : index
    %183 = vector.load %arg7[%c15, %c0_189, %c0_190] : memref<16x2x32xf32, #tpu.memory_space<vmem>>, vector<1x2x32xf32>
    %184 = vector.shape_cast %183 : vector<1x2x32xf32> to vector<2x32xf32>
    %cst_191 = arith.constant dense<0.000000e+00> : vector<2x16xf32>
    %185 = tpu.matmul %184, %76, %cst_191 {dimension_numbers = #tpu.dot_dimension_numbers<[1], [0], [0], [1], [0, 0, 1, 1], [], []>} : vector<2x32xf32>, vector<32x16xf32>, vector<2x16xf32> -> vector<2x16xf32>
    %c15_192 = arith.constant 15 : index
    %c0_193 = arith.constant 0 : index
    %c0_194 = arith.constant 0 : index
    %186 = vector.load %arg8[%c15_192, %c0_193, %c0_194] : memref<16x16x32xf32, #tpu.memory_space<vmem>>, vector<1x16x32xf32>
    %187 = vector.shape_cast %186 : vector<1x16x32xf32> to vector<16x32xf32>
    %cst_195 = arith.constant dense<0.000000e+00> : vector<2x32xf32>
    %188 = tpu.matmul %185, %187, %cst_195 {dimension_numbers = #tpu.dot_dimension_numbers<[1], [0], [0], [1], [0, 0, 1, 1], [], []>} : vector<2x16xf32>, vector<16x32xf32>, vector<2x32xf32> -> vector<2x32xf32>
    %189 = arith.addf %182, %188 : vector<2x32xf32>
    %c0_196 = arith.constant 0 : index
    %c0_197 = arith.constant 0 : index
    %190 = vector.load %arg9[%c0_196, %c0_197] : memref<1x32xf32, #tpu.memory_space<vmem>>, vector<1x32xf32>
    %191 = vector.broadcast %190 : vector<1x32xf32> to vector<2x32xf32>
    %192 = arith.addf %189, %191 : vector<2x32xf32>
    %cst_198 = arith.constant 0.000000e+00 : f32
    %193 = vector.broadcast %cst_198 : f32 to vector<2x32xf32>
    %194 = arith.maximumf %192, %193 : vector<2x32xf32>
    %c0_199 = arith.constant 0 : index
    %c0_200 = arith.constant 0 : index
    %195 = vector.load %arg10[%c0_199, %c0_200] : memref<32x10xf32, #tpu.memory_space<vmem>>, vector<32x10xf32>
    %cst_201 = arith.constant dense<0.000000e+00> : vector<2x10xf32>
    %196 = tpu.matmul %194, %195, %cst_201 {dimension_numbers = #tpu.dot_dimension_numbers<[1], [0], [0], [1], [0, 0, 1, 1], [], []>} : vector<2x32xf32>, vector<32x10xf32>, vector<2x10xf32> -> vector<2x10xf32>
    %c0_202 = arith.constant 0 : index
    %c0_203 = arith.constant 0 : index
    %197 = vector.load %arg11[%c0_202, %c0_203] : memref<1x10xf32, #tpu.memory_space<vmem>>, vector<1x10xf32>
    %198 = vector.broadcast %197 : vector<1x10xf32> to vector<2x10xf32>
    %199 = arith.addf %196, %198 : vector<2x10xf32>
    %cst_204 = arith.constant 0.000000e+00 : f32
    %200 = vector.broadcast %cst_204 : f32 to vector<2x10xf32>
    %201 = arith.maximumf %199, %200 : vector<2x10xf32>
    %c0_205 = arith.constant 0 : index
    %c0_206 = arith.constant 0 : index
    %202 = vector.load %arg12[%c0_205, %c0_206] : memref<2x10xf32, #tpu.memory_space<vmem>>, vector<2x10xf32>
    tpu.vector_store %arg12[%c0_205, %c0_206], %201 {strides = array<i32>} : memref<2x10xf32, #tpu.memory_space<vmem>>, vector<2x10xf32>,
    return
  }
  func.func @transform_0(%arg0: i32) -> (i32, i32) {
    %c0_i32 = arith.constant 0 : i32
    %c0_i32_0 = arith.constant 0 : i32
    %c0_i32_1 = arith.constant 0 : i32
    return %c0_i32, %c0_i32_0 : i32, i32
  }
  func.func @transform_1(%arg0: i32) -> (i32, i32) {
    %c0_i32 = arith.constant 0 : i32
    %c0_i32_0 = arith.constant 0 : i32
    %c0_i32_1 = arith.constant 0 : i32
    return %c0_i32, %c0_i32_0 : i32, i32
  }
  func.func @transform_2(%arg0: i32) -> (i32, i32) {
    %c0_i32 = arith.constant 0 : i32
    %c0_i32_0 = arith.constant 0 : i32
    %c0_i32_1 = arith.constant 0 : i32
    return %c0_i32, %c0_i32_0 : i32, i32
  }
  func.func @transform_3(%arg0: i32) -> (i32, i32, i32) {
    %c0_i32 = arith.constant 0 : i32
    %c0_i32_0 = arith.constant 0 : i32
    %c0_i32_1 = arith.constant 0 : i32
    %c0_i32_2 = arith.constant 0 : i32
    return %c0_i32, %c0_i32_0, %c0_i32_1 : i32, i32, i32
  }
  func.func @transform_4(%arg0: i32) -> (i32, i32, i32) {
    %c0_i32 = arith.constant 0 : i32
    %c0_i32_0 = arith.constant 0 : i32
    %c0_i32_1 = arith.constant 0 : i32
    %c0_i32_2 = arith.constant 0 : i32
    return %c0_i32, %c0_i32_0, %c0_i32_1 : i32, i32, i32
  }
  func.func @transform_5(%arg0: i32) -> (i32, i32) {
    %c0_i32 = arith.constant 0 : i32
    %c0_i32_0 = arith.constant 0 : i32
    %c0_i32_1 = arith.constant 0 : i32
    return %c0_i32, %c0_i32_0 : i32, i32
  }
  func.func @transform_6(%arg0: i32) -> (i32, i32, i32) {
    %c0_i32 = arith.constant 0 : i32
    %c0_i32_0 = arith.constant 0 : i32
    %c0_i32_1 = arith.constant 0 : i32
    %c0_i32_2 = arith.constant 0 : i32
    return %c0_i32, %c0_i32_0, %c0_i32_1 : i32, i32, i32
  }
  func.func @transform_7(%arg0: i32) -> (i32, i32, i32) {
    %c0_i32 = arith.constant 0 : i32
    %c0_i32_0 = arith.constant 0 : i32
    %c0_i32_1 = arith.constant 0 : i32
    %c0_i32_2 = arith.constant 0 : i32
    return %c0_i32, %c0_i32_0, %c0_i32_1 : i32, i32, i32
  }
  func.func @transform_8(%arg0: i32) -> (i32, i32) {
    %c0_i32 = arith.constant 0 : i32
    %c0_i32_0 = arith.constant 0 : i32
    %c0_i32_1 = arith.constant 0 : i32
    return %c0_i32, %c0_i32_0 : i32, i32
  }
  func.func @transform_9(%arg0: i32) -> (i32, i32) {
    %c0_i32 = arith.constant 0 : i32
    %c0_i32_0 = arith.constant 0 : i32
    %c0_i32_1 = arith.constant 0 : i32
    return %c0_i32, %c0_i32_0 : i32, i32
  }
  func.func @transform_10(%arg0: i32) -> (i32, i32) {
    %c0_i32 = arith.constant 0 : i32
    %c0_i32_0 = arith.constant 0 : i32
    %c0_i32_1 = arith.constant 0 : i32
    return %c0_i32, %c0_i32_0 : i32, i32
  }
  func.func @transform_11(%arg0: i32) -> (i32, i32) {
    %c0_i32 = arith.constant 0 : i32
    %c0_i32_0 = arith.constant 0 : i32
    %c0_i32_1 = arith.constant 0 : i32
    return %c0_i32, %c0_i32_0 : i32, i32
  }
}

</mosaic_0001>

<bundles_post_ra>
// kernel: convnet_forward.1
= control target key start
LH: loop header
LB: loop body
LE: loop exit
PB: predicated region body
PF: predicated region fallthrough
CT: control target
= control target key end

     0   :  { %vm113_vm0 = vcmask 1043456   ;;  %s2829_s0 = inlined_call_operand.vmem [shape: f32[128,36], index: 0, kind: input, shape index: {}]   ;;  %s2830_s1 = inlined_call_operand.vmem [shape: f32[36,8], index: 1, kind: input, shape index: {}]   ;;  %s2831_s2 = inlined_call_operand.vmem [shape: f32[1,8], index: 2, kind: input, shape index: {}]   ;;  %s2832_s3 = inlined_call_operand.vmem [shape: f32[9,32,128], index: 3, kind: input, shape index: {}]   ;;  %s2833_s4 = inlined_call_operand.vmem [shape: f32[9,8,16], index: 4, kind: input, shape index: {}]   ;;  %s2834_s5 = inlined_call_operand.vmem [shape: f32[1,16], index: 5, kind: input, shape index: {}]   ;;  %s2835_s6 = inlined_call_operand.vmem [shape: f32[16,2,32], index: 6, kind: input, shape index: {}]   ;;  %s2836_s7 = inlined_call_operand.vmem [shape: f32[16,16,32], index: 7, kind: input, shape index: {}]   ;;  %s2837_s8 = inlined_call_operand.vmem [shape: f32[1,32], index: 8, kind: input, shape index: {}]   ;;  %s2838_s9 = inlined_call_operand.vmem [shape: f32[32,10], index: 9, kind: input, shape index: {}]   ;;  %s2839_s10 = inlined_call_operand.vmem [shape: f32[1,10], index: 10, kind: input, shape index: {}]   ;;  %s2840_s11 = inlined_call_operand.hbm [shape: f32[2,10], index: 11, kind: output, shape index: {}]  }
   0x1   :  { %v59_v0 = vld [vmem:[%s2830_s1 + $0x20] sm:$0xf]  ;;  %v58_v1 = vld [vmem:[%s2830_s1 + $0x18] sm:$0xff]  ;;  %v57_v2 = vld [vmem:[%s2830_s1 + $0x10] sm:$0xff] }
   0x2   :  { %1816 = vmatpush.msk.msra.mxu0 %vm113_vm0, %v59_v0  ;;  %v56_v3 = vld [vmem:[%s2830_s1 + $0x8] sm:$0xff] }
   0x4   :  { %129 = vmatpush.msra.mxu0 %v58_v1 }
   0x5   :  { %16 = vsyncpa [#allocation3], 0  ;;  %v55_v4 = vld [vmem:[%s2830_s1] sm:$0xff]  ;;  %vm64_vm1 = vcmask 293888   ;;  %v40_v6 = vld [vmem:[%s2829_s0 + $0x8] sm:$0xff]  ;;  %vm268_vm2 = vcmask 64512  }
   0x6   :  { %130 = vmatpush.msra.mxu0 %v57_v2  ;;  %v39_v5 = vld [vmem:[%s2829_s0] sm:$0xff]  ;;  %v41_v7 = vld [vmem:[%s2829_s0 + $0x10] sm:$0xff]  ;;  %v42_v8 = vld [vmem:[%s2829_s0 + $0x18] sm:$0xff]  ;;  %vm931_vm3 = vcmask 261120   ;;  %vm985_vm4 = vcmask 130048   ;;  %s2018_s24 = smov [#allocation2]  }
   0x7   :  { %v43_v9 = vld [vmem:[%s2829_s0 + $0x20] sm:$0xff]  ;;  %v44_v10 = vld [vmem:[%s2829_s0 + $0x28] sm:$0xff]  ;;  %v45_v11 = vld [vmem:[%s2829_s0 + $0x30] sm:$0xff]  ;;  %s1807_s27 = sshll.u32 %s2840_s11, 4  ;;  %vm1798_vm5 = vcmask 74752   ;;  %s1808_s27 = int_to_ptr.hbm [resolvable:$true] %s1807_s27 }
   0x8   :  { %131 = vmatpush.msra.mxu0 %v56_v3  ;;  %v46_v12 = vld [vmem:[%s2829_s0 + $0x38] sm:$0xff]  ;;  %v47_v13 = vld [vmem:[%s2829_s0 + $0x40] sm:$0xff]  ;;  %v48_v14 = vld [vmem:[%s2829_s0 + $0x48] sm:$0xff] }
   0x9   :  { %v49_v15 = vld [vmem:[%s2829_s0 + $0x50] sm:$0xff]  ;;  %v50_v16 = vld [vmem:[%s2829_s0 + $0x58] sm:$0xff]  ;;  %v51_v17 = vld [vmem:[%s2829_s0 + $0x60] sm:$0xff] }
   0xa   :  { %132 = vmatpush.msra.mxu0 %v55_v4  ;;  %v52_v18 = vld [vmem:[%s2829_s0 + $0x68] sm:$0xff]  ;;  %v53_v19 = vld [vmem:[%s2829_s0 + $0x70] sm:$0xff]  ;;  %v54_v20 = vld [vmem:[%s2829_s0 + $0x78] sm:$0xff] }
   0xb   :  { %1817 = vmatmul.msk.f32.vlgmr.msra.gmra.mxu0 %vm64_vm1, %v39_v5  ;;  %v1988_v36 = vld [vmem:[%s2831_s2] ss:$0 sm:$0xff] }
  0x13   :  { %1818 = vmatmul.msk.f32.gmra.mxu0 %vm64_vm1, %v40_v6  ;;  %v198_v6 = vld [vmem:[%s2832_s3] sm:$0xff] }
  0x1b   :  { %1819 = vmatmul.msk.f32.gmra.mxu0 %vm64_vm1, %v41_v7  ;;  %v1833_v7 = vld [vmem:[%s2832_s3 + $0x20] sm:$0xff] }
  0x23   :  { %1820 = vmatmul.msk.f32.gmra.mxu0 %vm64_vm1, %v42_v8  ;;  %v1850_v8 = vld [vmem:[%s2833_s4 + $0x10] sm:$0xff] }
  0x2b   :  { %1821 = vmatmul.msk.f32.gmra.mxu0 %vm64_vm1, %v43_v9  ;;  %v199_v9 = vld [vmem:[%s2832_s3 + $0x8] sm:$0xff] }
  0x33   :  { %1822 = vmatmul.msk.f32.gmra.mxu0 %vm64_vm1, %v44_v10  ;;  %v1834_v10 = vld [vmem:[%s2832_s3 + $0x28] sm:$0xff] }
  0x3b   :  { %1823 = vmatmul.msk.f32.gmra.mxu0 %vm64_vm1, %v45_v11  ;;  %v200_v11 = vld [vmem:[%s2832_s3 + $0x10] sm:$0xff] }
  0x43   :  { %1824 = vmatmul.msk.f32.gmra.mxu0 %vm64_vm1, %v46_v12  ;;  %v1835_v12 = vld [vmem:[%s2832_s3 + $0x30] sm:$0xff] }
  0x4b   :  { %1825 = vmatmul.msk.f32.gmra.mxu0 %vm64_vm1, %v47_v13  ;;  %v201_v13 = vld [vmem:[%s2832_s3 + $0x18] sm:$0xff] }
  0x53   :  { %1826 = vmatmul.msk.f32.gmra.mxu0 %vm64_vm1, %v48_v14  ;;  %v1836_v14 = vld [vmem:[%s2832_s3 + $0x38] sm:$0xff] }
  0x5b   :  { %1827 = vmatmul.msk.f32.gmra.mxu0 %vm64_vm1, %v49_v15  ;;  %v1859_v15 = vld [vmem:[%s2833_s4 + $0x18] sm:$0xff] }
  0x63   :  { %1828 = vmatmul.msk.f32.gmra.mxu0 %vm64_vm1, %v50_v16  ;;  %v1846_v16 = vld [vmem:[%s2832_s3 + $0x40] sm:$0xff] }
  0x6b   :  { %1829 = vmatmul.msk.f32.gmra.mxu0 %vm64_vm1, %v51_v17  ;;  %v1847_v17 = vld [vmem:[%s2832_s3 + $0x48] sm:$0xff] }
  0x73   :  { %1830 = vmatmul.msk.f32.gmra.mxu0 %vm64_vm1, %v52_v18  ;;  %v1848_v18 = vld [vmem:[%s2832_s3 + $0x50] sm:$0xff] }
  0x7b   :  { %1831 = vmatmul.msk.f32.gmra.mxu0 %vm64_vm1, %v53_v19  ;;  %v1849_v19 = vld [vmem:[%s2832_s3 + $0x58] sm:$0xff] }
  0x83   :  { %1832 = vmatmul.msk.f32.gmra.mxu0 %vm64_vm1, %v54_v20  ;;  %v1837_v20 = vld [vmem:[%s2833_s4 + $0x8] sm:$0xff] }
  0x84   :  { %296 = vmatpush.msra.mxu3 %v1837_v20 }
  0x88   :  { %v2158_v21 = vpop.f32.mrf.mxu0 }
  0x89   :  { %v135_v2 = vadd.f32 %v1988_v36, %v2158_v21  ;;  %v231_v21 = vld [vmem:[%s2833_s4] sm:$0xff] }
  0x8a   :  { %337 = vmatpush.msrb.mxu3 %v231_v21 }
  0x8b   :  { %v2225_v5 = vmax.f32 %v135_v2, 0.0 }
  0x90   :  { %v2160_v22 = vpop.f32.mrf.mxu0 }
  0x91   :  { %v138_v0 = vadd.f32 %v1988_v36, %v2160_v22 }
  0x93   :  { %v2221_v4 = vmax.f32 %v138_v0, 0.0 }
  0x98   :  { %v140_v23 = vpop.f32.mrf.mxu0 }
  0x99   :  { %v141_v62 = vadd.f32 %v1988_v36, %v140_v23 }
  0x9b   :  { %v2217_v3 = vmax.f32 %v141_v62, 0.0 }
  0xa0   :  { %v143_v24 = vpop.f32.mrf.mxu0 }
  0xa1   :  { %v144_v60 = vadd.f32 %v1988_v36, %v143_v24 }
  0xa3   :  { %v2212_v1 = vmax.f32 %v144_v60, 0.0 }
  0xa8   :  { %v146_v25 = vpop.f32.mrf.mxu0 }
  0xa9   :  { %v147_v58 = vadd.f32 %v1988_v36, %v146_v25 }
  0xab   :  { %v2207_v63 = vmax.f32 %v147_v58, 0.0 }
  0xb0   :  { %v149_v26 = vpop.f32.mrf.mxu0 }
  0xb1   :  { %v150_v56 = vadd.f32 %v1988_v36, %v149_v26 }
  0xb3   :  { %v2203_v61 = vmax.f32 %v150_v56, 0.0 }
  0xb8   :  { %v152_v27 = vpop.f32.mrf.mxu0 }
  0xb9   :  { %v153_v54 = vadd.f32 %v1988_v36, %v152_v27 }
  0xbb   :  { %v2199_v59 = vmax.f32 %v153_v54, 0.0 }
  0xc0   :  { %v155_v28 = vpop.f32.mrf.mxu0 }
  0xc1   :  { %v156_v52 = vadd.f32 %v1988_v36, %v155_v28 }
  0xc3   :  { %v2195_v57 = vmax.f32 %v156_v52, 0.0 }
  0xc8   :  { %v158_v29 = vpop.f32.mrf.mxu0 }
  0xc9   :  { %v159_v50 = vadd.f32 %v1988_v36, %v158_v29 }
  0xcb   :  { %v2191_v55 = vmax.f32 %v159_v50, 0.0 }
  0xd0   :  { %v161_v30 = vpop.f32.mrf.mxu0 }
  0xd1   :  { %v162_v48 = vadd.f32 %v1988_v36, %v161_v30 }
  0xd3   :  { %v2187_v53 = vmax.f32 %v162_v48, 0.0 }
  0xd8   :  { %v164_v31 = vpop.f32.mrf.mxu0 }
  0xd9   :  { %v165_v46 = vadd.f32 %v1988_v36, %v164_v31  ;;  %v1868_v31 = vld [vmem:[%s2833_s4 + $0x20] sm:$0xff] }
  0xdb   :  { %v2183_v51 = vmax.f32 %v165_v46, 0.0 }
  0xe0   :  { %v167_v32 = vpop.f32.mrf.mxu0 }
  0xe1   :  { %v168_v44 = vadd.f32 %v1988_v36, %v167_v32 }
  0xe3   :  { %v2179_v49 = vmax.f32 %v168_v44, 0.0  ;;  %v1858_v44 = vld [vmem:[%s2832_s3 + $0x78] sm:$0xff] }
  0xe8   :  { %v170_v33 = vpop.f32.mrf.mxu0 }
  0xe9   :  { %v171_v42 = vadd.f32 %v1988_v36, %v170_v33 }
  0xeb   :  { %v2175_v47 = vmax.f32 %v171_v42, 0.0  ;;  %v1867_v42 = vld [vmem:[%s2832_s3 + $0x98] sm:$0xff] }
  0xf0   :  { %v173_v34 = vpop.f32.mrf.mxu0 }
  0xf1   :  { %v174_v40 = vadd.f32 %v1988_v36, %v173_v34 }
  0xf3   :  { %v2171_v45 = vmax.f32 %v174_v40, 0.0  ;;  %v1857_v40 = vld [vmem:[%s2832_s3 + $0x70] sm:$0xff] }
  0xf8   :  { %v176_v35 = vpop.f32.mrf.mxu0 }
  0xf9   :  { %v177_v38 = vadd.f32 %v1988_v36, %v176_v35  ;;  %v1864_v35 = vld [vmem:[%s2832_s3 + $0x80] sm:$0xff] }
  0xfb   :  { %v2167_v43 = vmax.f32 %v177_v38, 0.0  ;;  %v1856_v38 = vld [vmem:[%s2832_s3 + $0x68] sm:$0xff] }
 0x100   :  { %v179_v37 = vpop.f32.mrf.mxu0 }
 0x101   :  { %v180_v39 = vadd.f32 %v1988_v36, %v179_v37  ;;  %v1855_v36 = vld [vmem:[%s2832_s3 + $0x60] sm:$0xff]  ;;  %v1865_v37 = vld [vmem:[%s2832_s3 + $0x88] sm:$0xff] }
 0x103   :  { %v2165_v41 = vmax.f32 %v180_v39, 0.0  ;;  %v1866_v39 = vld [vmem:[%s2832_s3 + $0x90] sm:$0xff] }
 0x105   :  { %202 = vmatpush.msra.mxu1 %v2165_v41  ;;  %237 = vmatpush.msra.mxu2 %v2165_v41 }
 0x107   :  { %203 = vmatpush.msra.mxu1 %v2167_v43  ;;  %238 = vmatpush.msra.mxu2 %v2167_v43 }
 0x109   :  { %204 = vmatpush.msra.mxu1 %v2171_v45  ;;  %239 = vmatpush.msra.mxu2 %v2171_v45 }
 0x10b   :  { %205 = vmatpush.msra.mxu1 %v2175_v47  ;;  %240 = vmatpush.msra.mxu2 %v2175_v47 }
 0x10d   :  { %206 = vmatpush.msra.mxu1 %v2179_v49  ;;  %241 = vmatpush.msra.mxu2 %v2179_v49 }
 0x10f   :  { %207 = vmatpush.msra.mxu1 %v2183_v51  ;;  %242 = vmatpush.msra.mxu2 %v2183_v51 }
 0x111   :  { %208 = vmatpush.msra.mxu1 %v2187_v53  ;;  %243 = vmatpush.msra.mxu2 %v2187_v53 }
 0x113   :  { %209 = vmatpush.msra.mxu1 %v2191_v55  ;;  %244 = vmatpush.msra.mxu2 %v2191_v55 }
 0x115   :  { %210 = vmatpush.msra.mxu1 %v2195_v57  ;;  %245 = vmatpush.msra.mxu2 %v2195_v57 }
 0x117   :  { %211 = vmatpush.msra.mxu1 %v2199_v59  ;;  %246 = vmatpush.msra.mxu2 %v2199_v59 }
 0x119   :  { %212 = vmatpush.msra.mxu1 %v2203_v61  ;;  %247 = vmatpush.msra.mxu2 %v2203_v61 }
 0x11b   :  { %213 = vmatpush.msra.mxu1 %v2207_v63  ;;  %248 = vmatpush.msra.mxu2 %v2207_v63 }
 0x11d   :  { %214 = vmatpush.msra.mxu1 %v2212_v1  ;;  %249 = vmatpush.msra.mxu2 %v2212_v1 }
 0x11f   :  { %215 = vmatpush.msra.mxu1 %v2217_v3  ;;  %250 = vmatpush.msra.mxu2 %v2217_v3 }
 0x121   :  { %216 = vmatpush.msra.mxu1 %v2221_v4  ;;  %251 = vmatpush.msra.mxu2 %v2221_v4 }
 0x123   :  { %217 = vmatpush.msra.mxu1 %v2225_v5  ;;  %252 = vmatpush.msra.mxu2 %v2225_v5 }
 0x124   :  { %218 = vmatmul.f32.vlgmr.msra.gmra.mxu1 %v198_v6  ;;  %253 = vmatmul.f32.vlgmr.msra.gmra.mxu2 %v1833_v7 }
 0x125   :  { %356 = vmatpush.msrb.mxu1 %v2165_v41  ;;  %414 = vmatpush.msrb.mxu2 %v1850_v8 }
 0x127   :  { %518 = vmatpush.msra.mxu2 %v2165_v41  ;;  %357 = vmatpush.msrb.mxu1 %v2167_v43 }
 0x129   :  { %519 = vmatpush.msra.mxu2 %v2167_v43  ;;  %358 = vmatpush.msrb.mxu1 %v2171_v45 }
 0x12b   :  { %520 = vmatpush.msra.mxu2 %v2171_v45  ;;  %359 = vmatpush.msrb.mxu1 %v2175_v47 }
 0x12c   :  { %221 = vmatmul.f32.gmra.mxu1 %v199_v9  ;;  %256 = vmatmul.f32.gmra.mxu2 %v1834_v10 }
 0x12d   :  { %521 = vmatpush.msra.mxu2 %v2175_v47  ;;  %360 = vmatpush.msrb.mxu1 %v2179_v49 }
 0x12f   :  { %522 = vmatpush.msra.mxu2 %v2179_v49  ;;  %361 = vmatpush.msrb.mxu1 %v2183_v51 }
 0x131   :  { %523 = vmatpush.msra.mxu2 %v2183_v51  ;;  %362 = vmatpush.msrb.mxu1 %v2187_v53 }
 0x133   :  { %524 = vmatpush.msra.mxu2 %v2187_v53  ;;  %363 = vmatpush.msrb.mxu1 %v2191_v55 }
 0x134   :  { %224 = vmatmul.f32.gmra.mxu1 %v200_v11  ;;  %259 = vmatmul.f32.gmra.mxu2 %v1835_v12  ;;  %v1892_v11 = vld [vmem:[%s2832_s3 + $0xe8] sm:$0xff]  ;;  %v1902_v12 = vld [vmem:[%s2832_s3 + $0x110] sm:$0xff] }
 0x135   :  { %525 = vmatpush.msra.mxu2 %v2191_v55  ;;  %364 = vmatpush.msrb.mxu1 %v2195_v57 }
 0x137   :  { %526 = vmatpush.msra.mxu2 %v2195_v57  ;;  %365 = vmatpush.msrb.mxu1 %v2199_v59 }
 0x139   :  { %527 = vmatpush.msra.mxu2 %v2199_v59  ;;  %366 = vmatpush.msrb.mxu1 %v2203_v61 }
 0x13b   :  { %528 = vmatpush.msra.mxu2 %v2203_v61  ;;  %367 = vmatpush.msrb.mxu1 %v2207_v63 }
 0x13c   :  { %227 = vmatmul.f32.gmra.mxu1 %v201_v13  ;;  %262 = vmatmul.f32.gmra.mxu2 %v1836_v14  ;;  %v1893_v13 = vld [vmem:[%s2832_s3 + $0xf0] sm:$0xff]  ;;  %v1903_v14 = vld [vmem:[%s2832_s3 + $0x118] sm:$0xff] }
 0x13d   :  { %529 = vmatpush.msra.mxu2 %v2207_v63  ;;  %368 = vmatpush.msrb.mxu1 %v2212_v1 }
 0x13f   :  { %530 = vmatpush.msra.mxu2 %v2212_v1  ;;  %369 = vmatpush.msrb.mxu1 %v2217_v3 }
 0x141   :  { %531 = vmatpush.msra.mxu2 %v2217_v3  ;;  %370 = vmatpush.msrb.mxu1 %v2221_v4 }
 0x143   :  { %532 = vmatpush.msra.mxu2 %v2221_v4  ;;  %371 = vmatpush.msrb.mxu1 %v2225_v5 }
 0x144   :  { %372 = vmatmul.f32.vlgmr.msrb.gmra.mxu1 %v1846_v16 }
 0x145   :  { %495 = vmatpush.msra.mxu1 %v1859_v15  ;;  %533 = vmatpush.msra.mxu2 %v2225_v5  ;;  %v1894_v15 = vld [vmem:[%s2832_s3 + $0xf8] sm:$0xff] }
 0x147   :  { %599 = vmatpush.msrb.mxu1 %v2165_v41 }
 0x149   :  { %600 = vmatpush.msrb.mxu1 %v2167_v43 }
 0x14b   :  { %601 = vmatpush.msrb.mxu1 %v2171_v45 }
 0x14c   :  { %375 = vmatmul.f32.gmra.mxu1 %v1847_v17  ;;  %v1877_v17 = vld [vmem:[%s2833_s4 + $0x28] sm:$0xff] }
 0x14d   :  { %602 = vmatpush.msrb.mxu1 %v2175_v47 }
 0x14f   :  { %603 = vmatpush.msrb.mxu1 %v2179_v49 }
 0x151   :  { %604 = vmatpush.msrb.mxu1 %v2183_v51 }
 0x153   :  { %605 = vmatpush.msrb.mxu1 %v2187_v53 }
 0x154   :  { %378 = vmatmul.f32.gmra.mxu1 %v1848_v18 }
 0x155   :  { %606 = vmatpush.msrb.mxu1 %v2191_v55 }
 0x157   :  { %607 = vmatpush.msrb.mxu1 %v2195_v57 }
 0x159   :  { %608 = vmatpush.msrb.mxu1 %v2199_v59 }
 0x15b   :  { %609 = vmatpush.msrb.mxu1 %v2203_v61 }
 0x15c   :  { %381 = vmatmul.f32.gmra.mxu1 %v1849_v19 }
 0x15d   :  { %610 = vmatpush.msrb.mxu1 %v2207_v63 }
 0x15f   :  { %611 = vmatpush.msrb.mxu1 %v2212_v1 }
 0x161   :  { %612 = vmatpush.msrb.mxu1 %v2217_v3 }
 0x163   :  { %613 = vmatpush.msrb.mxu1 %v2221_v4 }
 0x165   :  { %614 = vmatpush.msrb.mxu1 %v2225_v5 }
 0x1a1   :  { %v219_v22 = vpop.f32.mrf.mxu1 }
 0x1a7   :  { %v254_v23 = vpop.f32.mrf.mxu2 }
 0x1a8   :  { %1838 = vmatmul.msk.f32.vlgmr.msra.gmra.mxu3 %vm268_vm2, %v254_v23 }
 0x1a9   :  { %437 = vmatpush.msra.mxu3 %v2165_v41  ;;  %v222_v24 = vpop.f32.mrf.mxu1 }
 0x1ab   :  { %438 = vmatpush.msra.mxu3 %v2167_v43 }
 0x1ad   :  { %439 = vmatpush.msra.mxu3 %v2171_v45 }
 0x1af   :  { %440 = vmatpush.msra.mxu3 %v2175_v47  ;;  %v257_v25 = vpop.f32.mrf.mxu2 }
 0x1b0   :  { %1839 = vmatmul.msk.f32.gmra.mxu3 %vm268_vm2, %v257_v25 }
 0x1b1   :  { %v225_v26 = vpop.f32.mrf.mxu1  ;;  %441 = vmatpush.msra.mxu3 %v2179_v49 }
 0x1b3   :  { %442 = vmatpush.msra.mxu3 %v2183_v51 }
 0x1b5   :  { %443 = vmatpush.msra.mxu3 %v2187_v53 }
 0x1b7   :  { %444 = vmatpush.msra.mxu3 %v2191_v55  ;;  %v260_v27 = vpop.f32.mrf.mxu2 }
 0x1b8   :  { %1840 = vmatmul.msk.f32.gmra.mxu3 %vm268_vm2, %v260_v27 }
 0x1b9   :  { %v228_v28 = vpop.f32.mrf.mxu1  ;;  %445 = vmatpush.msra.mxu3 %v2195_v57 }
 0x1bb   :  { %446 = vmatpush.msra.mxu3 %v2199_v59 }
 0x1bd   :  { %447 = vmatpush.msra.mxu3 %v2203_v61 }
 0x1bf   :  { %448 = vmatpush.msra.mxu3 %v2207_v63  ;;  %v263_v29 = vpop.f32.mrf.mxu2 }
 0x1c0   :  { %1841 = vmatmul.msk.f32.gmra.mxu3 %vm268_vm2, %v263_v29 }
 0x1c1   :  { %449 = vmatpush.msra.mxu3 %v2212_v1  ;;  %v373_v30 = vpop.f32.mrf.mxu1 }
 0x1c2   :  { %1851 = vmatmul.msk.f32.vlgmr.msrb.gmra.mxu2 %vm268_vm2, %v373_v30 }
 0x1c3   :  { %450 = vmatpush.msra.mxu3 %v2217_v3  ;;  %657 = vmatpush.msrb.mxu2 %v1877_v17 }
 0x1c5   :  { %451 = vmatpush.msra.mxu3 %v2221_v4 }
 0x1c7   :  { %452 = vmatpush.msra.mxu3 %v2225_v5 }
 0x1c8   :  { %1842 = vmatmul.msk.f32.vlgmr.msrb.gmra.mxu3 %vm268_vm2, %v219_v22 }
 0x1c9   :  { %v376_v32 = vpop.f32.mrf.mxu1  ;;  %576 = vmatpush.msrb.mxu3 %v1868_v31 }
 0x1ca   :  { %1852 = vmatmul.msk.f32.gmra.mxu2 %vm268_vm2, %v376_v32 }
 0x1d0   :  { %1843 = vmatmul.msk.f32.gmra.mxu3 %vm268_vm2, %v222_v24 }
 0x1d1   :  { %v379_v33 = vpop.f32.mrf.mxu1 }
 0x1d2   :  { %1853 = vmatmul.msk.f32.gmra.mxu2 %vm268_vm2, %v379_v33 }
 0x1d8   :  { %1844 = vmatmul.msk.f32.gmra.mxu3 %vm268_vm2, %v225_v26 }
 0x1d9   :  { %v382_v34 = vpop.f32.mrf.mxu1 }
 0x1da   :  { %1854 = vmatmul.msk.f32.gmra.mxu2 %vm268_vm2, %v382_v34 }
 0x1e0   :  { %1845 = vmatmul.msk.f32.gmra.mxu3 %vm268_vm2, %v228_v28 }
 0x1e2   :  { %534 = vmatmul.f32.vlgmr.msra.gmra.mxu2 %v1864_v35 }
 0x1e8   :  { %453 = vmatmul.f32.vlgmr.msra.gmra.mxu3 %v1855_v36 }
 0x1e9   :  { %680 = vmatpush.msra.mxu3 %v2165_v41 }
 0x1ea   :  { %537 = vmatmul.f32.gmra.mxu2 %v1865_v37 }
 0x1eb   :  { %681 = vmatpush.msra.mxu3 %v2167_v43 }
 0x1ed   :  { %682 = vmatpush.msra.mxu3 %v2171_v45 }
 0x1ef   :  { %683 = vmatpush.msra.mxu3 %v2175_v47 }
 0x1f0   :  { %456 = vmatmul.f32.gmra.mxu3 %v1856_v38 }
 0x1f1   :  { %684 = vmatpush.msra.mxu3 %v2179_v49 }
 0x1f2   :  { %540 = vmatmul.f32.gmra.mxu2 %v1866_v39 }
 0x1f3   :  { %685 = vmatpush.msra.mxu3 %v2183_v51 }
 0x1f5   :  { %686 = vmatpush.msra.mxu3 %v2187_v53 }
 0x1f7   :  { %687 = vmatpush.msra.mxu3 %v2191_v55 }
 0x1f8   :  { %459 = vmatmul.f32.gmra.mxu3 %v1857_v40  ;;  %v1895_v40 = vld [vmem:[%s2833_s4 + $0x38] sm:$0xff] }
 0x1f9   :  { %688 = vmatpush.msra.mxu3 %v2195_v57  ;;  %819 = vmatpush.msra.mxu2 %v1895_v40  ;;  %v1916_v40 = vld [vmem:[%s2835_s6 + $0x4] sm:$0x3] }
 0x1fa   :  { %543 = vmatmul.f32.gmra.mxu2 %v1867_v42 }
 0x1fb   :  { %689 = vmatpush.msra.mxu3 %v2199_v59 }
 0x1fd   :  { %690 = vmatpush.msra.mxu3 %v2203_v61 }
 0x1ff   :  { %691 = vmatpush.msra.mxu3 %v2207_v63 }
 0x200   :  { %462 = vmatmul.f32.gmra.mxu3 %v1858_v44 }
 0x201   :  { %692 = vmatpush.msra.mxu3 %v2212_v1 }
 0x203   :  { %693 = vmatpush.msra.mxu3 %v2217_v3 }
 0x205   :  { %694 = vmatpush.msra.mxu3 %v2221_v4 }
 0x207   :  { %695 = vmatpush.msra.mxu3 %v2225_v5 }
 0x22b   :  { %v2398_v46 = vpop.f32.mrf.mxu3 }
 0x233   :  { %v2400_v48 = vpop.f32.mrf.mxu3 }
 0x23b   :  { %v2402_v50 = vpop.f32.mrf.mxu3 }
 0x243   :  { %v2404_v52 = vpop.f32.mrf.mxu3 }
 0x245   :  { %v2406_v54 = vpop.f32.mrf.mxu2 }
 0x24b   :  { %v2408_v56 = vpop.f32.mrf.mxu3 }
 0x24c   :  { %v340_v16 = vadd.f32 %v2408_v56, %v2398_v46 }
 0x24d   :  { %v2410_v58 = vpop.f32.mrf.mxu2 }
 0x24e   :  { %v428_v18 = vadd.f32 %v2406_v54, %v340_v16 }
 0x253   :  { %v2412_v60 = vpop.f32.mrf.mxu3 }
 0x254   :  { %v343_v22 = vadd.f32 %v2412_v60, %v2400_v48  ;;  %v1904_v48 = vld [vmem:[%s2833_s4 + $0x40] sm:$0xff] }
 0x255   :  { %v2414_v62 = vpop.f32.mrf.mxu2 }
 0x256   :  { %v429_v24 = vadd.f32 %v2410_v58, %v343_v22 }
 0x25b   :  { %v2416_v0 = vpop.f32.mrf.mxu3 }
 0x25c   :  { %v346_v28 = vadd.f32 %v2416_v0, %v2402_v50 }
 0x25d   :  { %v2418_v2 = vpop.f32.mrf.mxu2 }
 0x25e   :  { %v430_v30 = vadd.f32 %v2414_v62, %v346_v28 }
 0x263   :  { %v2420_v6 = vpop.f32.mrf.mxu3 }
 0x264   :  { %v349_v34 = vadd.f32 %v2420_v6, %v2404_v52 }
 0x265   :  { %v535_v7 = vpop.f32.mrf.mxu2 }
 0x266   :  { %1869 = vmatmul.msk.f32.vlgmr.msrb.gmra.mxu3 %vm268_vm2, %v535_v7  ;;  %v431_v36 = vadd.f32 %v2418_v2, %v349_v34 }
 0x267   :  { %842 = vmatpush.msrb.mxu3 %v2165_v41 }
 0x269   :  { %843 = vmatpush.msrb.mxu3 %v2167_v43 }
 0x26b   :  { %844 = vmatpush.msrb.mxu3 %v2171_v45  ;;  %v454_v8 = vpop.f32.mrf.mxu3 }
 0x26c   :  { %1860 = vmatmul.msk.f32.vlgmr.msra.gmra.mxu1 %vm268_vm2, %v454_v8 }
 0x26d   :  { %761 = vmatpush.msra.mxu1 %v2165_v41  ;;  %845 = vmatpush.msrb.mxu3 %v2175_v47  ;;  %v538_v9 = vpop.f32.mrf.mxu2 }
 0x26e   :  { %1870 = vmatmul.msk.f32.gmra.mxu3 %vm268_vm2, %v538_v9 }
 0x26f   :  { %762 = vmatpush.msra.mxu1 %v2167_v43  ;;  %846 = vmatpush.msrb.mxu3 %v2179_v49 }
 0x271   :  { %763 = vmatpush.msra.mxu1 %v2171_v45  ;;  %847 = vmatpush.msrb.mxu3 %v2183_v51 }
 0x273   :  { %764 = vmatpush.msra.mxu1 %v2175_v47  ;;  %848 = vmatpush.msrb.mxu3 %v2187_v53  ;;  %v457_v10 = vpop.f32.mrf.mxu3 }
 0x274   :  { %1861 = vmatmul.msk.f32.gmra.mxu1 %vm268_vm2, %v457_v10 }
 0x275   :  { %765 = vmatpush.msra.mxu1 %v2179_v49  ;;  %849 = vmatpush.msrb.mxu3 %v2191_v55  ;;  %v541_v41 = vpop.f32.mrf.mxu2  ;;  %v1882_v49 = vld [vmem:[%s2832_s3 + $0xc0] sm:$0xff] }
 0x276   :  { %1871 = vmatmul.msk.f32.gmra.mxu3 %vm268_vm2, %v541_v41 }
 0x277   :  { %766 = vmatpush.msra.mxu1 %v2183_v51  ;;  %850 = vmatpush.msrb.mxu3 %v2195_v57  ;;  %v1886_v51 = vld [vmem:[%s2833_s4 + $0x30] sm:$0xff] }
 0x278   :  { %738 = vmatpush.msrb.mxu0 %v1886_v51 }
 0x279   :  { %767 = vmatpush.msra.mxu1 %v2187_v53  ;;  %851 = vmatpush.msrb.mxu3 %v2199_v59  ;;  %v1873_v53 = vld [vmem:[%s2832_s3 + $0xa0] sm:$0xff] }
 0x27a   :  { %900 = vmatpush.msra.mxu0 %v1904_v48  ;;  %v1956_v48 = vld [vmem:[%s2835_s6 + $0x14] sm:$0x3] }
 0x27b   :  { %768 = vmatpush.msra.mxu1 %v2191_v55  ;;  %852 = vmatpush.msrb.mxu3 %v2203_v61  ;;  %v460_v43 = vpop.f32.mrf.mxu3  ;;  %v1883_v55 = vld [vmem:[%s2832_s3 + $0xc8] sm:$0xff] }
 0x27c   :  { %1862 = vmatmul.msk.f32.gmra.mxu1 %vm268_vm2, %v460_v43 }
 0x27d   :  { %769 = vmatpush.msra.mxu1 %v2195_v57  ;;  %853 = vmatpush.msrb.mxu3 %v2207_v63  ;;  %v544_v45 = vpop.f32.mrf.mxu2  ;;  %v1874_v57 = vld [vmem:[%s2832_s3 + $0xa8] sm:$0xff] }
 0x27e   :  { %1872 = vmatmul.msk.f32.gmra.mxu3 %vm268_vm2, %v544_v45 }
 0x27f   :  { %770 = vmatpush.msra.mxu1 %v2199_v59  ;;  %854 = vmatpush.msrb.mxu3 %v2212_v1  ;;  %v1884_v59 = vld [vmem:[%s2832_s3 + $0xd0] sm:$0xff] }
 0x281   :  { %771 = vmatpush.msra.mxu1 %v2203_v61  ;;  %855 = vmatpush.msrb.mxu3 %v2217_v3  ;;  %v1875_v61 = vld [vmem:[%s2832_s3 + $0xb0] sm:$0xff] }
 0x283   :  { %772 = vmatpush.msra.mxu1 %v2207_v63  ;;  %856 = vmatpush.msrb.mxu3 %v2221_v4  ;;  %v463_v47 = vpop.f32.mrf.mxu3  ;;  %v1885_v63 = vld [vmem:[%s2832_s3 + $0xd8] sm:$0xff] }
 0x284   :  { %1863 = vmatmul.msk.f32.gmra.mxu1 %vm268_vm2, %v463_v47 }
 0x285   :  { %773 = vmatpush.msra.mxu1 %v2212_v1  ;;  %857 = vmatpush.msrb.mxu3 %v2225_v5  ;;  %v1876_v1 = vld [vmem:[%s2832_s3 + $0xb8] sm:$0xff] }
 0x286   :  { %696 = vmatmul.f32.vlgmr.msra.gmra.mxu3 %v1882_v49 }
 0x287   :  { %774 = vmatpush.msra.mxu1 %v2217_v3  ;;  %v1900_v3 = vld [vmem:[%s2832_s3 + $0x100] sm:$0xff] }
 0x289   :  { %775 = vmatpush.msra.mxu1 %v2221_v4  ;;  %v1891_v4 = vld [vmem:[%s2832_s3 + $0xe0] sm:$0xff] }
 0x28b   :  { %776 = vmatpush.msra.mxu1 %v2225_v5  ;;  %v1901_v5 = vld [vmem:[%s2832_s3 + $0x108] sm:$0xff] }
 0x28c   :  { %615 = vmatmul.f32.vlgmr.msrb.gmra.mxu1 %v1873_v53 }
 0x28e   :  { %699 = vmatmul.f32.gmra.mxu3 %v1883_v55 }
 0x294   :  { %618 = vmatmul.f32.gmra.mxu1 %v1874_v57 }
 0x296   :  { %702 = vmatmul.f32.gmra.mxu3 %v1884_v59  ;;  %v1913_v59 = vld [vmem:[%s2836_s7 + $0x18] sm:$0xff] }
 0x297   :  { %1003 = vmatpush.msra.mxu3 %v1913_v59  ;;  %v1939_v59 = vld [vmem:[%s2836_s7 + $0x68] sm:$0xff] }
 0x29c   :  { %621 = vmatmul.f32.gmra.mxu1 %v1875_v61  ;;  %v1912_v61 = vld [vmem:[%s2836_s7 + $0x10] sm:$0xff] }
 0x29d   :  { %1004 = vmatpush.msra.mxu3 %v1912_v61 }
 0x29e   :  { %705 = vmatmul.f32.gmra.mxu3 %v1885_v63 }
 0x2a4   :  { %624 = vmatmul.f32.gmra.mxu1 %v1876_v1 }
 0x2a6   :  { %858 = vmatmul.f32.vlgmr.msrb.gmra.mxu3 %v1900_v3 }
 0x2ac   :  { %777 = vmatmul.f32.vlgmr.msra.gmra.mxu1 %v1891_v4 }
 0x2ae   :  { %861 = vmatmul.f32.gmra.mxu3 %v1901_v5 }
 0x2b4   :  { %780 = vmatmul.f32.gmra.mxu1 %v1892_v11 }
 0x2b6   :  { %864 = vmatmul.f32.gmra.mxu3 %v1902_v12 }
 0x2bc   :  { %783 = vmatmul.f32.gmra.mxu1 %v1893_v13 }
 0x2be   :  { %867 = vmatmul.f32.gmra.mxu3 %v1903_v14 }
 0x2c4   :  { %786 = vmatmul.f32.gmra.mxu1 %v1894_v15 }
 0x2e9   :  { %v497_v19 = vpop.f32.mrf.mxu1  ;;  %v578_v20 = vpop.f32.mrf.mxu3 }
 0x2ea   :  { %v509_v21 = vadd.f32 %v497_v19, %v428_v18 }
 0x2ec   :  { %v2521_v23 = vadd.f32 %v578_v20, %v509_v21 }
 0x2f1   :  { %v500_v25 = vpop.f32.mrf.mxu1  ;;  %v581_v26 = vpop.f32.mrf.mxu3 }
 0x2f2   :  { %v510_v27 = vadd.f32 %v500_v25, %v429_v24 }
 0x2f4   :  { %v2526_v29 = vadd.f32 %v581_v26, %v510_v27  ;;  %v1989_v27 = vld [vmem:[%s2834_s5] ss:$0 sm:$0xff]  ;;  %s1805_s5 = sshll.u32 %s2018_s24, 4  ;;  %s1806_s5 = int_to_ptr.vmem [resolvable:$true] %s1805_s5 }
 0x2f9   :  { %v503_v31 = vpop.f32.mrf.mxu1  ;;  %v584_v32 = vpop.f32.mrf.mxu3 }
 0x2fa   :  { %v511_v33 = vadd.f32 %v503_v31, %v430_v30 }
 0x2fc   :  { %v592_v35 = vadd.f32 %v584_v32, %v511_v33 }
 0x301   :  { %v506_v37 = vpop.f32.mrf.mxu1  ;;  %v587_v38 = vpop.f32.mrf.mxu3 }
 0x302   :  { %v512_v39 = vadd.f32 %v506_v37, %v431_v36 }
 0x304   :  { %v593_v42 = vadd.f32 %v587_v38, %v512_v39  ;;  %v1910_v38 = vld [vmem:[%s2835_s6 + $0x2] sm:$0x3]  ;;  %v930_v39 = vld [vmem:[%s2835_s6] sm:$0x3] }
 0x309   :  { %v616_v44 = vpop.f32.mrf.mxu1  ;;  %v697_v46 = vpop.f32.mrf.mxu3 }
 0x30a   :  { %1878 = vmatmul.msk.f32.vlgmr.msrb.gmra.mxu2 %vm268_vm2, %v616_v44  ;;  %1887 = vmatmul.msk.f32.vlgmr.msrb.gmra.mxu0 %vm268_vm2, %v697_v46  ;;  %v1936_v44 = vld [vmem:[%s2835_s6 + $0xc] sm:$0x3]  ;;  %v1946_v46 = vld [vmem:[%s2835_s6 + $0x10] sm:$0x3] }
 0x311   :  { %v619_v50 = vpop.f32.mrf.mxu1  ;;  %v700_v52 = vpop.f32.mrf.mxu3 }
 0x312   :  { %1879 = vmatmul.msk.f32.gmra.mxu2 %vm268_vm2, %v619_v50  ;;  %1888 = vmatmul.msk.f32.gmra.mxu0 %vm268_vm2, %v700_v52  ;;  %v956_v50 = vld [vmem:[%s2836_s7 + $0x8] sm:$0xff]  ;;  %v955_v52 = vld [vmem:[%s2836_s7] sm:$0xff] }
 0x319   :  { %v622_v54 = vpop.f32.mrf.mxu1  ;;  %v703_v56 = vpop.f32.mrf.mxu3 }
 0x31a   :  { %1880 = vmatmul.msk.f32.gmra.mxu2 %vm268_vm2, %v622_v54  ;;  %1889 = vmatmul.msk.f32.gmra.mxu0 %vm268_vm2, %v703_v56  ;;  %v1919_v54 = vld [vmem:[%s2836_s7 + $0x28] sm:$0xff]  ;;  %v1918_v56 = vld [vmem:[%s2836_s7 + $0x20] sm:$0xff] }
 0x31b   :  { %1077 = vmatpush.msrb.mxu0 %v1919_v54 }
 0x31d   :  { %1078 = vmatpush.msrb.mxu0 %v1918_v56 }
 0x321   :  { %v625_v58 = vpop.f32.mrf.mxu1  ;;  %v706_v60 = vpop.f32.mrf.mxu3 }
 0x322   :  { %1881 = vmatmul.msk.f32.gmra.mxu2 %vm268_vm2, %v625_v58  ;;  %1890 = vmatmul.msk.f32.gmra.mxu0 %vm268_vm2, %v706_v60 }
 0x329   :  { %v778_v62 = vpop.f32.mrf.mxu1  ;;  %v859_v0 = vpop.f32.mrf.mxu3 }
 0x32a   :  { %1896 = vmatmul.msk.f32.vlgmr.msra.gmra.mxu2 %vm268_vm2, %v778_v62  ;;  %1905 = vmatmul.msk.f32.vlgmr.msra.gmra.mxu0 %vm268_vm2, %v859_v0  ;;  %v1921_v62 = vld [vmem:[%s2835_s6 + $0x6] sm:$0x3] }
 0x331   :  { %v781_v2 = vpop.f32.mrf.mxu1  ;;  %v862_v6 = vpop.f32.mrf.mxu3 }
 0x332   :  { %1897 = vmatmul.msk.f32.gmra.mxu2 %vm268_vm2, %v781_v2  ;;  %1906 = vmatmul.msk.f32.gmra.mxu0 %vm268_vm2, %v862_v6  ;;  %v1966_v2 = vld [vmem:[%s2835_s6 + $0x18] sm:$0x3]  ;;  %v1931_v6 = vld [vmem:[%s2835_s6 + $0xa] sm:$0x3] }
 0x339   :  { %v784_v7 = vpop.f32.mrf.mxu1  ;;  %v865_v8 = vpop.f32.mrf.mxu3 }
 0x33a   :  { %1898 = vmatmul.msk.f32.gmra.mxu2 %vm268_vm2, %v784_v7  ;;  %1907 = vmatmul.msk.f32.gmra.mxu0 %vm268_vm2, %v865_v8  ;;  %v1976_v7 = vld [vmem:[%s2835_s6 + $0x1c] sm:$0x3]  ;;  %v1941_v8 = vld [vmem:[%s2835_s6 + $0xe] sm:$0x3] }
 0x341   :  { %v787_v9 = vpop.f32.mrf.mxu1  ;;  %v868_v10 = vpop.f32.mrf.mxu3 }
 0x342   :  { %1899 = vmatmul.msk.f32.gmra.mxu2 %vm268_vm2, %v787_v9  ;;  %1908 = vmatmul.msk.f32.gmra.mxu0 %vm268_vm2, %v868_v10  ;;  %v1951_v9 = vld [vmem:[%s2835_s6 + $0x12] sm:$0x3]  ;;  %v1961_v10 = vld [vmem:[%s2835_s6 + $0x16] sm:$0x3] }
 0x387   :  { %v740_v41 = vpop.f32.mrf.mxu0 }
 0x38d   :  { %v659_v43 = vpop.f32.mrf.mxu2 }
 0x38e   :  { %v671_v13 = vadd.f32 %v659_v43, %v2521_v23  ;;  %v1981_v43 = vld [vmem:[%s2835_s6 + $0x1e] sm:$0x3] }
 0x38f   :  { %v743_v45 = vpop.f32.mrf.mxu0 }
 0x390   :  { %v752_v18 = vadd.f32 %v740_v41, %v671_v13  ;;  %v1971_v41 = vld [vmem:[%s2835_s6 + $0x1a] sm:$0x3]  ;;  %v1958_v13 = vld [vmem:[%s2836_s7 + $0xa0] sm:$0xff] }
 0x395   :  { %v662_v47 = vpop.f32.mrf.mxu2 }
 0x396   :  { %v672_v12 = vadd.f32 %v662_v47, %v2526_v29  ;;  %v1923_v47 = vld [vmem:[%s2836_s7 + $0x30] sm:$0xff] }
 0x397   :  { %v746_v49 = vpop.f32.mrf.mxu0 }
 0x398   :  { %v753_v16 = vadd.f32 %v743_v45, %v672_v12  ;;  %v1924_v45 = vld [vmem:[%s2836_s7 + $0x38] sm:$0xff] }
 0x39d   :  { %v665_v51 = vpop.f32.mrf.mxu2 }
 0x39e   :  { %v673_v5 = vadd.f32 %v665_v51, %v592_v35 }
 0x39f   :  { %v749_v53 = vpop.f32.mrf.mxu0 }
 0x3a0   :  { %v754_v14 = vadd.f32 %v746_v49, %v673_v5  ;;  %v1929_v49 = vld [vmem:[%s2836_s7 + $0x48] sm:$0xff] }
 0x3a1   :  { %1181 = vmatpush.msra.mxu0 %v1929_v49 }
 0x3a5   :  { %v668_v55 = vpop.f32.mrf.mxu2 }
 0x3a6   :  { %v674_v15 = vadd.f32 %v668_v55, %v593_v42  ;;  %v1926_v42 = vld [vmem:[%s2835_s6 + $0x8] sm:$0x3]  ;;  %v1934_v55 = vld [vmem:[%s2836_s7 + $0x58] sm:$0xff] }
 0x3a7   :  { %v902_v57 = vpop.f32.mrf.mxu0 }
 0x3a8   :  { %v755_v19 = vadd.f32 %v749_v53, %v674_v15  ;;  %v1928_v53 = vld [vmem:[%s2836_s7 + $0x40] sm:$0xff] }
 0x3a9   :  { %1182 = vmatpush.msra.mxu0 %v1928_v53 }
 0x3ad   :  { %v821_v63 = vpop.f32.mrf.mxu2 }
 0x3ae   :  { %v833_v24 = vadd.f32 %v821_v63, %v752_v18  ;;  %v1938_v63 = vld [vmem:[%s2836_s7 + $0x60] sm:$0xff] }
 0x3af   :  { %v905_v1 = vpop.f32.mrf.mxu0  ;;  %v1968_v18 = vld [vmem:[%s2836_s7 + $0xc0] sm:$0xff] }
 0x3b0   :  { %v914_v30 = vadd.f32 %v902_v57, %v833_v24  ;;  %v1933_v57 = vld [vmem:[%s2836_s7 + $0x50] sm:$0xff] }
 0x3b1   :  { %v1953_v24 = vld [vmem:[%s2836_s7 + $0x90] sm:$0xff] }
 0x3b2   :  { %v922_v34 = vadd.f32 %v1989_v27, %v914_v30  ;;  %v1974_v30 = vld [vmem:[%s2836_s7 + $0xd8] sm:$0xff] }
 0x3b4   :  { %v2577_v37 = vmax.f32 %v922_v34, 0.0  ;;  %v1983_v34 = vld [vmem:[%s2836_s7 + $0xf0] sm:$0xff] }
 0x3b5   :  { %v824_v3 = vpop.f32.mrf.mxu2 }
 0x3b6   :  { %v834_v20 = vadd.f32 %v824_v3, %v753_v16  ;;  %v1969_v16 = vld [vmem:[%s2836_s7 + $0xc8] sm:$0xff] }
 0x3b7   :  { %v908_v4 = vpop.f32.mrf.mxu0 }
 0x3b8   :  { %v915_v28 = vadd.f32 %v905_v1, %v834_v20  ;;  %v1949_v1 = vld [vmem:[%s2836_s7 + $0x88] sm:$0xff]  ;;  %v1954_v20 = vld [vmem:[%s2836_s7 + $0x98] sm:$0xff] }
 0x3ba   :  { %v923_v32 = vadd.f32 %v1989_v27, %v915_v28 }
 0x3bc   :  { %v2572_v36 = vmax.f32 %v923_v32, 0.0  ;;  %v1984_v32 = vld [vmem:[%s2836_s7 + $0xf8] sm:$0xff] }
 0x3bd   :  { %v827_v11 = vpop.f32.mrf.mxu2 }
 0x3be   :  { %v835_v17 = vadd.f32 %v827_v11, %v754_v14  ;;  %v1959_v11 = vld [vmem:[%s2836_s7 + $0xa8] sm:$0xff]  ;;  %v1944_v14 = vld [vmem:[%s2836_s7 + $0x78] sm:$0xff] }
 0x3bf   :  { %v911_v22 = vpop.f32.mrf.mxu0 }
 0x3c0   :  { %v916_v25 = vadd.f32 %v908_v4, %v835_v17  ;;  %v1948_v4 = vld [vmem:[%s2836_s7 + $0x80] sm:$0xff]  ;;  %v1943_v17 = vld [vmem:[%s2836_s7 + $0x70] sm:$0xff] }
 0x3c2   :  { %v924_v23 = vadd.f32 %v1989_v27, %v916_v25  ;;  %v1978_v25 = vld [vmem:[%s2836_s7 + $0xe0] sm:$0xff] }
 0x3c4   :  { %v2567_v35 = vmax.f32 %v924_v23, 0.0 }
 0x3c5   :  { %v830_v21 = vpop.f32.mrf.mxu2 }
 0x3c6   :  { %v836_v26 = vadd.f32 %v830_v21, %v755_v19 }
 0x3c8   :  { %v917_v29 = vadd.f32 %v911_v22, %v836_v26  ;;  %v1979_v22 = vld [vmem:[%s2836_s7 + $0xe8] sm:$0xff] }
 0x3ca   :  { %v925_v31 = vadd.f32 %v1989_v27, %v917_v29  ;;  %v1964_v27 = vld [vmem:[%s2836_s7 + $0xb8] sm:$0xff]  ;;  %v1963_v29 = vld [vmem:[%s2836_s7 + $0xb0] sm:$0xff] }
 0x3cc   :  { %v2565_v33 = vmax.f32 %v925_v31, 0.0  ;;  %v1973_v31 = vld [vmem:[%s2836_s7 + $0xd0] sm:$0xff] }
 0x3ce   :  { %947 = vmatpush.msrb.mxu1 %v2565_v33  ;;  %974 = vmatpush.msrb.mxu2 %v2565_v33 }
 0x3cf   :  { %1101 = vmatpush.msrb.mxu3 %v2565_v33 }
 0x3d0   :  { %948 = vmatpush.msrb.mxu1 %v2567_v35  ;;  %975 = vmatpush.msrb.mxu2 %v2567_v35 }
 0x3d1   :  { %1102 = vmatpush.msrb.mxu3 %v2567_v35 }
 0x3d2   :  { %949 = vmatpush.msrb.mxu1 %v2572_v36  ;;  %976 = vmatpush.msrb.mxu2 %v2572_v36 }
 0x3d3   :  { %1103 = vmatpush.msrb.mxu3 %v2572_v36 }
 0x3d4   :  { %950 = vmatpush.msrb.mxu1 %v2577_v37  ;;  %977 = vmatpush.msrb.mxu2 %v2577_v37 }
 0x3d5   :  { %1104 = vmatpush.msrb.mxu3 %v2577_v37  ;;  %1911 = vmatmul.msk.f32.vlgmr.msrb.gmra.mxu2 %vm931_vm3, %v1910_v38 }
 0x3d6   :  { %1049 = vmatpush.msra.mxu2 %v2565_v33  ;;  %1909 = vmatmul.msk.f32.vlgmr.msrb.gmra.mxu1 %vm931_vm3, %v930_v39 }
 0x3d7   :  { %1026 = vmatpush.msra.mxu1 %v956_v50 }
 0x3d8   :  { %1050 = vmatpush.msra.mxu2 %v2567_v35 }
 0x3d9   :  { %1027 = vmatpush.msra.mxu1 %v955_v52 }
 0x3da   :  { %1051 = vmatpush.msra.mxu2 %v2572_v36 }
 0x3db   :  { %1129 = vmatpush.msrb.mxu1 %v1924_v45 }
 0x3dc   :  { %1052 = vmatpush.msra.mxu2 %v2577_v37 }
 0x3dd   :  { %1917 = vmatmul.msk.f32.vlgmr.msra.gmra.mxu2 %vm931_vm3, %v1916_v40  ;;  %1130 = vmatpush.msrb.mxu1 %v1923_v47 }
 0x3de   :  { %1153 = vmatpush.msrb.mxu2 %v2565_v33 }
 0x3e0   :  { %1154 = vmatpush.msrb.mxu2 %v2567_v35 }
 0x3e2   :  { %1155 = vmatpush.msrb.mxu2 %v2572_v36 }
 0x3e4   :  { %1156 = vmatpush.msrb.mxu2 %v2577_v37 }
 0x3e5   :  { %1927 = vmatmul.msk.f32.vlgmr.msrb.gmra.mxu2 %vm931_vm3, %v1926_v42 }
 0x3e6   :  { %1257 = vmatpush.msra.mxu2 %v2565_v33 }
 0x3e8   :  { %1258 = vmatpush.msra.mxu2 %v2567_v35 }
 0x3ea   :  { %1259 = vmatpush.msra.mxu2 %v2572_v36 }
 0x3ec   :  { %1260 = vmatpush.msra.mxu2 %v2577_v37 }
 0x3ed   :  { %1937 = vmatmul.msk.f32.vlgmr.msra.gmra.mxu2 %vm931_vm3, %v1936_v44 }
 0x3ee   :  { %1361 = vmatpush.msrb.mxu2 %v2565_v33 }
 0x3f0   :  { %1362 = vmatpush.msrb.mxu2 %v2567_v35 }
 0x3f2   :  { %1363 = vmatpush.msrb.mxu2 %v2572_v36 }
 0x3f4   :  { %1364 = vmatpush.msrb.mxu2 %v2577_v37 }
 0x3f5   :  { %1947 = vmatmul.msk.f32.vlgmr.msrb.gmra.mxu2 %vm931_vm3, %v1946_v46 }
 0x3f6   :  { %1465 = vmatpush.msra.mxu2 %v2565_v33 }
 0x3f8   :  { %1466 = vmatpush.msra.mxu2 %v2567_v35 }
 0x3fa   :  { %1467 = vmatpush.msra.mxu2 %v2572_v36 }
 0x3fc   :  { %1468 = vmatpush.msra.mxu2 %v2577_v37 }
 0x3fd   :  { %1957 = vmatmul.msk.f32.vlgmr.msra.gmra.mxu2 %vm931_vm3, %v1956_v48 }
 0x3fe   :  { %1569 = vmatpush.msrb.mxu2 %v2565_v33 }
 0x400   :  { %1570 = vmatpush.msrb.mxu2 %v2567_v35 }
 0x402   :  { %1571 = vmatpush.msrb.mxu2 %v2572_v36 }
 0x404   :  { %1572 = vmatpush.msrb.mxu2 %v2577_v37 }
 0x405   :  { %1967 = vmatmul.msk.f32.vlgmr.msrb.gmra.mxu2 %vm931_vm3, %v1966_v2  ;;  %v1766_v2 = vld [vmem:[%s2838_s9] sm:$0xff] }
 0x406   :  { %1673 = vmatpush.msra.mxu2 %v2565_v33 }
 0x408   :  { %1674 = vmatpush.msra.mxu2 %v2567_v35 }
 0x40a   :  { %1675 = vmatpush.msra.mxu2 %v2572_v36 }
 0x40c   :  { %1676 = vmatpush.msra.mxu2 %v2577_v37 }
 0x40d   :  { %1977 = vmatmul.msk.f32.vlgmr.msra.gmra.mxu2 %vm931_vm3, %v1976_v7 }
 0x453   :  { %v952_v58 = vpop.f32.mrf.mxu1 }
 0x454   :  { %1915 = vmatmul.msk.f32.vlgmr.msra.gmra.mxu1 %vm985_vm4, %v952_v58  ;;  %v1769_v58 = vld [vmem:[%s2838_s9 + $0x18] sm:$0xff] }
 0x455   :  { %1233 = vmatpush.msra.mxu1 %v1934_v55  ;;  %1789 = vmatpush.msrb.mxu2 %v1769_v58 }
 0x457   :  { %1234 = vmatpush.msra.mxu1 %v1933_v57 }
 0x458   :  { %v979_v60 = vpop.f32.mrf.mxu2 }
 0x459   :  { %1914 = vmatmul.msk.f32.vlgmr.msra.gmra.mxu3 %vm985_vm4, %v979_v60 }
 0x45a   :  { %1205 = vmatpush.msra.mxu3 %v2565_v33 }
 0x45c   :  { %1206 = vmatpush.msra.mxu3 %v2567_v35 }
 0x45e   :  { %1207 = vmatpush.msra.mxu3 %v2572_v36 }
 0x460   :  { %1208 = vmatpush.msra.mxu3 %v2577_v37  ;;  %v1054_v0 = vpop.f32.mrf.mxu2 }
 0x461   :  { %1922 = vmatmul.msk.f32.vlgmr.msrb.gmra.mxu3 %vm931_vm3, %v1921_v62  ;;  %1920 = vmatmul.msk.f32.vlgmr.msrb.gmra.mxu0 %vm985_vm4, %v1054_v0  ;;  %v1768_v62 = vld [vmem:[%s2838_s9 + $0x10] sm:$0xff]  ;;  %v1767_v0 = vld [vmem:[%s2838_s9 + $0x8] sm:$0xff] }
 0x462   :  { %1309 = vmatpush.msrb.mxu3 %v2565_v33  ;;  %1285 = vmatpush.msrb.mxu0 %v1939_v59 }
 0x463   :  { %1790 = vmatpush.msrb.mxu2 %v1768_v62 }
 0x464   :  { %1310 = vmatpush.msrb.mxu3 %v2567_v35  ;;  %1286 = vmatpush.msrb.mxu0 %v1938_v63 }
 0x465   :  { %1791 = vmatpush.msrb.mxu2 %v1767_v0 }
 0x466   :  { %1311 = vmatpush.msrb.mxu3 %v2572_v36 }
 0x467   :  { %1792 = vmatpush.msrb.mxu2 %v1766_v2 }
 0x468   :  { %1312 = vmatpush.msrb.mxu3 %v2577_v37  ;;  %v1158_v51 = vpop.f32.mrf.mxu2 }
 0x469   :  { %1932 = vmatmul.msk.f32.vlgmr.msra.gmra.mxu3 %vm931_vm3, %v1931_v6  ;;  %1930 = vmatmul.msk.f32.vlgmr.msra.gmra.mxu0 %vm985_vm4, %v1158_v51 }
 0x46a   :  { %1413 = vmatpush.msra.mxu3 %v2565_v33  ;;  %1389 = vmatpush.msra.mxu0 %v1949_v1 }
 0x46c   :  { %1414 = vmatpush.msra.mxu3 %v2567_v35  ;;  %1390 = vmatpush.msra.mxu0 %v1948_v4 }
 0x46e   :  { %1415 = vmatpush.msra.mxu3 %v2572_v36 }
 0x470   :  { %1416 = vmatpush.msra.mxu3 %v2577_v37  ;;  %v1262_v61 = vpop.f32.mrf.mxu2 }
 0x471   :  { %1942 = vmatmul.msk.f32.vlgmr.msrb.gmra.mxu3 %vm931_vm3, %v1941_v8  ;;  %1940 = vmatmul.msk.f32.vlgmr.msrb.gmra.mxu0 %vm985_vm4, %v1262_v61  ;;  %v1990_v61 = vld [vmem:[%s2837_s8] ss:$0 sm:$0xff] }
 0x472   :  { %1517 = vmatpush.msrb.mxu3 %v2565_v33  ;;  %1493 = vmatpush.msrb.mxu0 %v1959_v11 }
 0x474   :  { %1518 = vmatpush.msrb.mxu3 %v2567_v35  ;;  %1494 = vmatpush.msrb.mxu0 %v1958_v13 }
 0x476   :  { %1519 = vmatpush.msrb.mxu3 %v2572_v36 }
 0x478   :  { %1520 = vmatpush.msrb.mxu3 %v2577_v37  ;;  %v1366_v3 = vpop.f32.mrf.mxu2 }
 0x479   :  { %1952 = vmatmul.msk.f32.vlgmr.msra.gmra.mxu3 %vm931_vm3, %v1951_v9  ;;  %1950 = vmatmul.msk.f32.vlgmr.msra.gmra.mxu0 %vm985_vm4, %v1366_v3 }
 0x47a   :  { %1621 = vmatpush.msra.mxu3 %v2565_v33  ;;  %1597 = vmatpush.msra.mxu0 %v1969_v16 }
 0x47c   :  { %1622 = vmatpush.msra.mxu3 %v2567_v35  ;;  %1598 = vmatpush.msra.mxu0 %v1968_v18 }
 0x47e   :  { %1623 = vmatpush.msra.mxu3 %v2572_v36 }
 0x480   :  { %1624 = vmatpush.msra.mxu3 %v2577_v37  ;;  %v1470_v12 = vpop.f32.mrf.mxu2 }
 0x481   :  { %1962 = vmatmul.msk.f32.vlgmr.msrb.gmra.mxu3 %vm931_vm3, %v1961_v10  ;;  %1960 = vmatmul.msk.f32.vlgmr.msrb.gmra.mxu0 %vm985_vm4, %v1470_v12 }
 0x482   :  { %1725 = vmatpush.msrb.mxu3 %v2565_v33  ;;  %1701 = vmatpush.msrb.mxu0 %v1979_v22 }
 0x484   :  { %1726 = vmatpush.msrb.mxu3 %v2567_v35  ;;  %1702 = vmatpush.msrb.mxu0 %v1978_v25 }
 0x486   :  { %1727 = vmatpush.msrb.mxu3 %v2572_v36 }
 0x488   :  { %1728 = vmatpush.msrb.mxu3 %v2577_v37  ;;  %v1574_v19 = vpop.f32.mrf.mxu2 }
 0x489   :  { %1972 = vmatmul.msk.f32.vlgmr.msra.gmra.mxu3 %vm931_vm3, %v1971_v41  ;;  %1970 = vmatmul.msk.f32.vlgmr.msra.gmra.mxu0 %vm985_vm4, %v1574_v19 }
 0x490   :  { %v1678_v26 = vpop.f32.mrf.mxu2 }
 0x491   :  { %1982 = vmatmul.msk.f32.vlgmr.msrb.gmra.mxu3 %vm931_vm3, %v1981_v43  ;;  %1980 = vmatmul.msk.f32.vlgmr.msrb.gmra.mxu0 %vm985_vm4, %v1678_v26 }
 0x4d1   :  { %v1029_v38 = vpop.f32.mrf.mxu1 }
 0x4dc   :  { %v1006_v5 = vpop.f32.mrf.mxu3 }
 0x4dd   :  { %v1030_v44 = vadd.f32 %v1029_v38, %v1006_v5  ;;  %v1991_v5 = vld [vmem:[%s2839_s10] ss:$0 sm:$0xff] }
 0x4de   :  { %v1080_v37 = vpop.f32.mrf.mxu0 }
 0x4df   :  { %v1083_v48 = vadd.f32 %v1080_v37, %v1030_v44 }
 0x4e4   :  { %v1106_v15 = vpop.f32.mrf.mxu3 }
 0x4e5   :  { %1925 = vmatmul.msk.f32.vlgmr.msrb.gmra.mxu1 %vm985_vm4, %v1106_v15 }
 0x4e6   :  { %1337 = vmatpush.msrb.mxu1 %v1944_v14  ;;  %v1184_v39 = vpop.f32.mrf.mxu0 }
 0x4e8   :  { %1338 = vmatpush.msrb.mxu1 %v1943_v17 }
 0x4ec   :  { %v1210_v21 = vpop.f32.mrf.mxu3 }
 0x4ed   :  { %1935 = vmatmul.msk.f32.vlgmr.msra.gmra.mxu1 %vm985_vm4, %v1210_v21 }
 0x4ee   :  { %1441 = vmatpush.msra.mxu1 %v1954_v20  ;;  %v1288_v42 = vpop.f32.mrf.mxu0 }
 0x4f0   :  { %1442 = vmatpush.msra.mxu1 %v1953_v24 }
 0x4f4   :  { %v1314_v28 = vpop.f32.mrf.mxu3 }
 0x4f5   :  { %1945 = vmatmul.msk.f32.vlgmr.msrb.gmra.mxu1 %vm985_vm4, %v1314_v28 }
 0x4f6   :  { %1545 = vmatpush.msrb.mxu1 %v1964_v27  ;;  %v1392_v52 = vpop.f32.mrf.mxu0 }
 0x4f8   :  { %1546 = vmatpush.msrb.mxu1 %v1963_v29 }
 0x4fc   :  { %v1418_v23 = vpop.f32.mrf.mxu3 }
 0x4fd   :  { %1955 = vmatmul.msk.f32.vlgmr.msra.gmra.mxu1 %vm985_vm4, %v1418_v23 }
 0x4fe   :  { %1649 = vmatpush.msra.mxu1 %v1974_v30  ;;  %v1496_v8 = vpop.f32.mrf.mxu0 }
 0x500   :  { %1650 = vmatpush.msra.mxu1 %v1973_v31 }
 0x504   :  { %v1522_v33 = vpop.f32.mrf.mxu3 }
 0x505   :  { %1965 = vmatmul.msk.f32.vlgmr.msrb.gmra.mxu1 %vm985_vm4, %v1522_v33 }
 0x506   :  { %1753 = vmatpush.msrb.mxu1 %v1984_v32  ;;  %v1600_v45 = vpop.f32.mrf.mxu0 }
 0x508   :  { %1754 = vmatpush.msrb.mxu1 %v1983_v34 }
 0x50c   :  { %v1626_v35 = vpop.f32.mrf.mxu3 }
 0x50d   :  { %1975 = vmatmul.msk.f32.vlgmr.msra.gmra.mxu1 %vm985_vm4, %v1626_v35 }
 0x50e   :  { %v1704_v57 = vpop.f32.mrf.mxu0 }
 0x514   :  { %v1730_v36 = vpop.f32.mrf.mxu3 }
 0x515   :  { %1985 = vmatmul.msk.f32.vlgmr.msrb.gmra.mxu1 %vm985_vm4, %v1730_v36 }
 0x562   :  { %v1132_v40 = vpop.f32.mrf.mxu1 }
 0x563   :  { %v1135_v50 = vadd.f32 %v1132_v40, %v1083_v48 }
 0x565   :  { %v1187_v56 = vadd.f32 %v1184_v39, %v1135_v50 }
 0x56a   :  { %v1236_v46 = vpop.f32.mrf.mxu1 }
 0x56b   :  { %v1239_v60 = vadd.f32 %v1236_v46, %v1187_v56 }
 0x56d   :  { %v1291_v6 = vadd.f32 %v1288_v42, %v1239_v60 }
 0x572   :  { %v1340_v54 = vpop.f32.mrf.mxu1 }
 0x573   :  { %v1343_v9 = vadd.f32 %v1340_v54, %v1291_v6 }
 0x575   :  { %v1395_v10 = vadd.f32 %v1392_v52, %v1343_v9 }
 0x57a   :  { %v1444_v7 = vpop.f32.mrf.mxu1 }
 0x57b   :  { %v1447_v41 = vadd.f32 %v1444_v7, %v1395_v10 }
 0x57d   :  { %v1499_v47 = vadd.f32 %v1496_v8, %v1447_v41 }
 0x582   :  { %v1548_v43 = vpop.f32.mrf.mxu1 }
 0x583   :  { %v1551_v49 = vadd.f32 %v1548_v43, %v1499_v47 }
 0x585   :  { %v1603_v53 = vadd.f32 %v1600_v45, %v1551_v49 }
 0x58a   :  { %v1652_v51 = vpop.f32.mrf.mxu1 }
 0x58b   :  { %v1655_v55 = vadd.f32 %v1652_v51, %v1603_v53 }
 0x58d   :  { %v1707_v59 = vadd.f32 %v1704_v57, %v1655_v55 }
 0x592   :  { %v1756_v63 = vpop.f32.mrf.mxu1 }
 0x593   :  { %v1759_v1 = vadd.f32 %v1756_v63, %v1707_v59 }
 0x595   :  { %v1764_v3 = vadd.f32 %v1990_v61, %v1759_v1 }
 0x597   :  { %v1765_v4 = vmax.f32 %v1764_v3, 0.0 }
 0x599   :  { %1986 = vmatmul.msk.f32.vlgmr.msrb.gmra.mxu2 %vm931_vm3, %v1765_v4 }
 0x61c   :  { %v1794_v11 = vpop.f32.mrf.mxu2 }
 0x61d   :  { %v1795_v12 = vadd.f32 %v1991_v5, %v1794_v11 }
 0x61f   :  { %v1797_v13 = vmax.f32 %v1795_v12, 0.0 }
 0x621   :  { %1799 = vst.msk [vmem:[#allocation2] sm:$0x3] %vm1798_vm5, %v1797_v13 }
 0x622   :  { %1810 = dma.vmem_to_hbm [thread:$0]  %s1806_s5, 32, %s1808_s27, [#allocation3]  }
 0x623   :  { %2016 = dma.done.wait [#allocation3], 32  }
 0x624   :  { %2017 = vsyncadd [#allocation3], 4294967264 }
 0x625   :  { %1815 = vsyncpa [#allocation3], 1 }

</bundles_post_ra>
